<compile_context>
chip_gen: v5e
topology: v5e:2x2
jax: 0.10.0
libtpu: 0.0.40
codegen_flags: <defaults>
</compile_context>

<pallas_src>
import math

import jax
import jax.numpy as jnp
from jax import lax
from jax.experimental import pallas as pl
from jax.experimental.pallas import tpu as pltpu

HIDDEN = 32              # hidden_size
D = 256                  # cross_attention_dim (module hardcodes 2048; scaled down)
HEADS = 2
HEAD_DIM = D // HEADS    # 128 -> lane-aligned head slices
SEQ = 8                  # text sequence length
QSEQ = 4                 # fixed by `reshape(1, 4, D)` in the module
SCALE = 1.0
LN_EPS = 1e-5            # nn.LayerNorm default eps


def _ncca_kernel(img_ref, wq_ref, bq_ref, text_ref, wkv_ref,
                 wfc2_ref, bfc2_ref, out_ref, q_sc, o_sc):
    # ---- Q path: fc1 -> reshape(4, D) -> to_q, folded into one packed dot.
    # wq_ref: (HIDDEN, QSEQ*D) bf16 (already scaled by 1/sqrt(HEAD_DIM)).
    img = img_ref[...].astype(jnp.bfloat16)                  # (1, HIDDEN)
    q_flat = (jnp.dot(img, wq_ref[...],
                      preferred_element_type=jnp.float32)
              + bq_ref[...])                                  # (1, QSEQ*D) f32
    for r in range(QSEQ):                                     # 4 lane-aligned row copies
        q_sc[pl.ds(r, 1), :] = q_flat[:, r * D:(r + 1) * D]

    # ---- K/V projections: one packed (SEQ, D) @ (D, 2D) matmul.
    text = text_ref[...].astype(jnp.bfloat16)                 # (SEQ, D)
    kv = jnp.dot(text, wkv_ref[...],
                 preferred_element_type=jnp.float32).astype(jnp.bfloat16)  # (SEQ, 2D)

    # ---- scaled_dot_product_attention (non-causal, no dropout), per head.
    for h in range(HEADS):
        sl = pl.ds(h * HEAD_DIM, HEAD_DIM)                    # lane-aligned 128-wide slice
        qh = q_sc[:, sl].astype(jnp.bfloat16)                 # (QSEQ, HEAD_DIM)
        kh = kv[:, h * HEAD_DIM:(h + 1) * HEAD_DIM]           # (SEQ,  HEAD_DIM) bf16
        vh = kv[:, D + h * HEAD_DIM:D + (h + 1) * HEAD_DIM]   # (SEQ,  HEAD_DIM) bf16
        # q @ k^T without materializing a transpose: contract dim 1 of both.
        s = lax.dot_general(qh, kh, (((1,), (1,)), ((), ())),
                            preferred_element_type=jnp.float32)   # (QSEQ, SEQ)
        m = jnp.max(s, axis=-1, keepdims=True)
        p = jnp.exp(s - m)
        denom = jnp.sum(p, axis=-1, keepdims=True)
        p = p * pl.reciprocal(denom, approx=True)
        o_sc[:, sl] = jnp.dot(p.astype(jnp.bfloat16), vh,
                              preferred_element_type=jnp.float32)

    # ---- LayerNorm (affine folded into fc2) -> fc2 (with gamma/beta/scale folded).
    o = o_sc[...]                                             # (QSEQ, D) f32
    mean = jnp.mean(o, axis=-1, keepdims=True)
    var = jnp.mean((o - mean) ** 2, axis=-1, keepdims=True)
    o = (o - mean) * lax.rsqrt(var + LN_EPS)
    out_ref[...] = (jnp.dot(o.astype(jnp.bfloat16), wfc2_ref[...],
                            preferred_element_type=jnp.float32)
                    + bfc2_ref[...])


def prepare_params(params):
    """One-time weight preparation (do NOT run per call):
    - fold fc1 into the Q projection and pack it as (HIDDEN, QSEQ*D),
      pre-scaled by 1/sqrt(HEAD_DIM),
    - pack Wk|Wv into one (D, 2D) matrix,
    - fold LayerNorm gamma/beta and the final `* scale` into fc2,
    - cast all matmul weights to bf16 (halves the weight DMA)."""
    inv_sqrt_d = 1.0 / math.sqrt(HEAD_DIM)

    # fc1_w: (HIDDEN, QSEQ*D); chunk r of fc1 feeds row r of the reshaped (4, D).
    wfc1 = params["fc1_w"].reshape(HIDDEN, QSEQ, D)                     # (H, 4, D)
    bfc1 = params["fc1_b"].reshape(QSEQ, D)                             # (4, D)
    wq_packed = jnp.einsum("hrd,de->hre", wfc1, params["wq"])           # (H, 4, D)
    wq_packed = (wq_packed * inv_sqrt_d).reshape(HIDDEN, QSEQ * D)
    bq_packed = ((bfc1 @ params["wq"]) * inv_sqrt_d).reshape(1, QSEQ * D)

    wkv = jnp.concatenate([params["wk"], params["wv"]], axis=1)         # (D, 2D)

    # Fold LN affine + SCALE into fc2:  (x*g + b) @ W + c  ==  x @ (g[:,None]*W) + (b@W + c)
    fc2_w_eff = (params["ln_g"][:, None] * params["fc2_w"]) * SCALE
    fc2_b_eff = ((params["ln_b"] @ params["fc2_w"]) + params["fc2_b"]) * SCALE

    return {
        "wq_packed": wq_packed.astype(jnp.bfloat16),
        "bq_packed": bq_packed.astype(jnp.float32),
        "wkv": wkv.astype(jnp.bfloat16),
        "fc2_w": fc2_w_eff.astype(jnp.bfloat16),
        "fc2_b": fc2_b_eff.reshape(1, D).astype(jnp.float32),
    }


def number_class_cross_attention(text_embeds, image_embeds, prepared):
    """Pallas forward over a batch of independent prompts.
    text_embeds: (B, SEQ, D) f32; image_embeds: (B, HIDDEN) f32."""
    B = text_embeds.shape[0]
    assert text_embeds.shape == (B, SEQ, D)
    assert image_embeds.shape == (B, HIDDEN)

    img3 = image_embeds.reshape(B, 1, HIDDEN)      # metadata-only reshape for a clean BlockSpec

    grid_spec = pltpu.PrefetchScalarGridSpec(
        num_scalar_prefetch=0,
        grid=(B,),
        in_specs=[
            pl.BlockSpec((None, 1, HIDDEN), lambda b: (b, 0, 0)),     # img (per-prompt)
            pl.BlockSpec((HIDDEN, QSEQ * D), lambda b: (0, 0)),       # Wq packed (resident)
            pl.BlockSpec((1, QSEQ * D), lambda b: (0, 0)),            # bq packed (resident)
            pl.BlockSpec((None, SEQ, D), lambda b: (b, 0, 0)),        # text (per-prompt)
            pl.BlockSpec((D, 2 * D), lambda b: (0, 0)),               # Wk|Wv (resident)
            pl.BlockSpec((D, D), lambda b: (0, 0)),                   # fc2_w_eff (resident)
            pl.BlockSpec((1, D), lambda b: (0, 0)),                   # fc2_b_eff (resident)
        ],
        out_specs=pl.BlockSpec((None, QSEQ, D), lambda b: (b, 0, 0)),
        scratch_shapes=[pltpu.VMEM((QSEQ, D), jnp.float32),           # folded Q
                        pltpu.VMEM((QSEQ, D), jnp.float32)],          # attention output
    )
    out = pl.pallas_call(
        _ncca_kernel,
        out_shape=jax.ShapeDtypeStruct((B, QSEQ, D), jnp.float32),
        grid_spec=grid_spec,
        compiler_params=pltpu.CompilerParams(
            dimension_semantics=("parallel",)),                       # shard batch on v7x cores
    )(img3, prepared["wq_packed"], prepared["bq_packed"], text_embeds,
      prepared["wkv"], prepared["fc2_w"], prepared["fc2_b"])
    return out


def reference(text_embeds, image_embeds, params):
    """Pure-JAX f32 mirror of the PyTorch forward (applied per prompt), for verification."""
    B = text_embeds.shape[0]
    img = image_embeds[:, None, :]                                # (B, 1, HIDDEN)
    x = img @ params["fc1_w"] + params["fc1_b"]                   # fc1
    x = x.reshape(B, QSEQ, D)                                     # reshape(1, 4, D) per prompt

    q = x @ params["wq"]
    k = text_embeds @ params["wk"]
    v = text_embeds @ params["wv"]

    def split_heads(a):
        b, s, _ = a.shape
        return a.reshape(b, s, HEADS, HEAD_DIM).transpose(0, 2, 1, 3)

    qh, kh, vh = split_heads(q), split_heads(k), split_heads(v)
    s = jnp.einsum('bhqd,bhkd->bhqk', qh, kh) / math.sqrt(HEAD_DIM)
    p = jax.nn.softmax(s, axis=-1)
    o = jnp.einsum('bhqk,bhkd->bhqd', p, vh)
    o = o.transpose(0, 2, 1, 3).reshape(B, QSEQ, D)

    mean = o.mean(-1, keepdims=True)
    var = ((o - mean) ** 2).mean(-1, keepdims=True)
    o = (o - mean) / jnp.sqrt(var + LN_EPS) * params["ln_g"] + params["ln_b"]
    o = o @ params["fc2_w"] + params["fc2_b"]
    return o * SCALE


def init_params(key):
    """Deterministic synthetic parameters (math layout: y = x @ W + b).
    to_q/to_k/to_v have no bias (diffusers Attention default)."""
    ks = jax.random.split(key, 8)
    n = jax.random.normal
    return {
        "fc1_w": n(ks[0], (HIDDEN, QSEQ * D), jnp.float32) * 0.05,
        "fc1_b": n(ks[1], (QSEQ * D,), jnp.float32) * 0.05,
        "wq": n(ks[2], (D, D), jnp.float32) * 0.05,
        "wk": n(ks[3], (D, D), jnp.float32) * 0.05,
        "wv": n(ks[4], (D, D), jnp.float32) * 0.05,
        "ln_g": jnp.ones((D,), jnp.float32),
        "ln_b": jnp.zeros((D,), jnp.float32),
        "fc2_w": n(ks[5], (D, D), jnp.float32) * 0.05,
        "fc2_b": n(ks[6], (D,), jnp.float32) * 0.05,
    }


if __name__ == "__main__":
    key = jax.random.PRNGKey(0)
    k_text, k_img, k_params = jax.random.split(key, 3)

    B = 2                                                # batch of independent prompts
    text_embeds = jax.random.normal(k_text, (B, SEQ, D), jnp.float32)
    image_embeds = jax.random.normal(k_img, (B, HIDDEN), jnp.float32)
    params = init_params(k_params)

    prepared = jax.tree_util.tree_map(jax.block_until_ready,
                                      prepare_params(params))  # one-time prep

    out = number_class_cross_attention(text_embeds, image_embeds, prepared)
    out = jax.block_until_ready(out)

    ref = reference(text_embeds, image_embeds, params)
    assert out.shape == (B, QSEQ, D)
    # bf16 matmul operands (f32 accumulate / softmax / LayerNorm) -> relaxed tol.
    assert jnp.allclose(out, ref, atol=5e-2, rtol=5e-2), "mismatch vs reference"

    print("KERNEL_OK")
</pallas_src>

<mosaic_0001>
module attributes {stable_mosaic.version = 11 : i64} {
  func.func @_ncca_kernel(%arg0: i32, %arg1: memref<1x1x32xf32, #tpu.memory_space<vmem>>, %arg2: memref<32x1024xbf16, #tpu.memory_space<vmem>>, %arg3: memref<1x1024xf32, #tpu.memory_space<vmem>>, %arg4: memref<1x8x256xf32, #tpu.memory_space<vmem>>, %arg5: memref<256x512xbf16, #tpu.memory_space<vmem>>, %arg6: memref<256x256xbf16, #tpu.memory_space<vmem>>, %arg7: memref<1x256xf32, #tpu.memory_space<vmem>>, %arg8: memref<1x4x256xf32, #tpu.memory_space<vmem>>, %arg9: memref<4x256xf32, #tpu.memory_space<vmem>>, %arg10: memref<4x256xf32, #tpu.memory_space<vmem>>) attributes {dimension_semantics = [#tpu.dimension_semantics<parallel>], iteration_bounds = array<i64: 2>, scalar_prefetch = 0 : i64, scratch_operands = 2 : i64, tpu.core_type = #tpu.core_type<tc>, window_params = [{transform_indices = @transform_0, window_bounds = array<i64: 1, 1, 32>}, {pipeline_mode = #tpu.pipeline_mode<synchronous>, transform_indices = @transform_1, window_bounds = array<i64: 32, 1024>}, {pipeline_mode = #tpu.pipeline_mode<synchronous>, transform_indices = @transform_2, window_bounds = array<i64: 1, 1024>}, {transform_indices = @transform_3, window_bounds = array<i64: 1, 8, 256>}, {pipeline_mode = #tpu.pipeline_mode<synchronous>, transform_indices = @transform_4, window_bounds = array<i64: 256, 512>}, {pipeline_mode = #tpu.pipeline_mode<synchronous>, transform_indices = @transform_5, window_bounds = array<i64: 256, 256>}, {pipeline_mode = #tpu.pipeline_mode<synchronous>, transform_indices = @transform_6, window_bounds = array<i64: 1, 256>}, {transform_indices = @transform_7, window_bounds = array<i64: 1, 4, 256>}]} {
    %c0 = arith.constant 0 : index
    %c0_0 = arith.constant 0 : index
    %c0_1 = arith.constant 0 : index
    %0 = vector.load %arg1[%c0, %c0_0, %c0_1] : memref<1x1x32xf32, #tpu.memory_space<vmem>>, vector<1x1x32xf32>
    %1 = vector.shape_cast %0 : vector<1x1x32xf32> to vector<1x32xf32>
    %2 = arith.truncf %1 : vector<1x32xf32> to vector<1x32xbf16>
    %c0_2 = arith.constant 0 : index
    %c0_3 = arith.constant 0 : index
    %3 = vector.load %arg2[%c0_2, %c0_3] : memref<32x1024xbf16, #tpu.memory_space<vmem>>, vector<32x1024xbf16>
    %cst = arith.constant dense<0.000000e+00> : vector<1x1024xf32>
    %4 = tpu.matmul %2, %3, %cst {dimension_numbers = #tpu.dot_dimension_numbers<[1], [0], [0], [1], [0, 0, 1, 1], [], []>} : vector<1x32xbf16>, vector<32x1024xbf16>, vector<1x1024xf32> -> vector<1x1024xf32>
    %c0_4 = arith.constant 0 : index
    %c0_5 = arith.constant 0 : index
    %5 = vector.load %arg3[%c0_4, %c0_5] : memref<1x1024xf32, #tpu.memory_space<vmem>>, vector<1x1024xf32>
    %6 = arith.addf %4, %5 : vector<1x1024xf32>
    %7 = vector.extract_strided_slice %6 {offsets = [0, 0], sizes = [1, 256], strides = [1, 1]} : vector<1x1024xf32> to vector<1x256xf32>
    %c0_6 = arith.constant 0 : index
    %c0_7 = arith.constant 0 : index
    %8 = vector.load %arg9[%c0_6, %c0_7] : memref<4x256xf32, #tpu.memory_space<vmem>>, vector<1x256xf32>
    tpu.vector_store %arg9[%c0_6, %c0_7], %7 {strides = array<i32>} : memref<4x256xf32, #tpu.memory_space<vmem>>, vector<1x256xf32>,
    %9 = vector.extract_strided_slice %6 {offsets = [0, 256], sizes = [1, 256], strides = [1, 1]} : vector<1x1024xf32> to vector<1x256xf32>
    %c1 = arith.constant 1 : index
    %c0_8 = arith.constant 0 : index
    %10 = vector.load %arg9[%c1, %c0_8] : memref<4x256xf32, #tpu.memory_space<vmem>>, vector<1x256xf32>
    tpu.vector_store %arg9[%c1, %c0_8], %9 {strides = array<i32>} : memref<4x256xf32, #tpu.memory_space<vmem>>, vector<1x256xf32>,
    %11 = vector.extract_strided_slice %6 {offsets = [0, 512], sizes = [1, 256], strides = [1, 1]} : vector<1x1024xf32> to vector<1x256xf32>
    %c2 = arith.constant 2 : index
    %c0_9 = arith.constant 0 : index
    %12 = vector.load %arg9[%c2, %c0_9] : memref<4x256xf32, #tpu.memory_space<vmem>>, vector<1x256xf32>
    tpu.vector_store %arg9[%c2, %c0_9], %11 {strides = array<i32>} : memref<4x256xf32, #tpu.memory_space<vmem>>, vector<1x256xf32>,
    %13 = vector.extract_strided_slice %6 {offsets = [0, 768], sizes = [1, 256], strides = [1, 1]} : vector<1x1024xf32> to vector<1x256xf32>
    %c3 = arith.constant 3 : index
    %c0_10 = arith.constant 0 : index
    %14 = vector.load %arg9[%c3, %c0_10] : memref<4x256xf32, #tpu.memory_space<vmem>>, vector<1x256xf32>
    tpu.vector_store %arg9[%c3, %c0_10], %13 {strides = array<i32>} : memref<4x256xf32, #tpu.memory_space<vmem>>, vector<1x256xf32>,
    %c0_11 = arith.constant 0 : index
    %c0_12 = arith.constant 0 : index
    %c0_13 = arith.constant 0 : index
    %15 = vector.load %arg4[%c0_11, %c0_12, %c0_13] : memref<1x8x256xf32, #tpu.memory_space<vmem>>, vector<1x8x256xf32>
    %16 = vector.shape_cast %15 : vector<1x8x256xf32> to vector<8x256xf32>
    %17 = arith.truncf %16 : vector<8x256xf32> to vector<8x256xbf16>
    %c0_14 = arith.constant 0 : index
    %c0_15 = arith.constant 0 : index
    %18 = vector.load %arg5[%c0_14, %c0_15] : memref<256x512xbf16, #tpu.memory_space<vmem>>, vector<256x512xbf16>
    %cst_16 = arith.constant dense<0.000000e+00> : vector<8x512xf32>
    %19 = tpu.matmul %17, %18, %cst_16 {dimension_numbers = #tpu.dot_dimension_numbers<[1], [0], [0], [1], [0, 0, 1, 1], [], []>} : vector<8x256xbf16>, vector<256x512xbf16>, vector<8x512xf32> -> vector<8x512xf32>
    %20 = arith.truncf %19 : vector<8x512xf32> to vector<8x512xbf16>
    %c0_17 = arith.constant 0 : index
    %c0_18 = arith.constant 0 : index
    %21 = vector.load %arg9[%c0_17, %c0_18] : memref<4x256xf32, #tpu.memory_space<vmem>>, vector<4x128xf32>
    %22 = arith.truncf %21 : vector<4x128xf32> to vector<4x128xbf16>
    %23 = vector.extract_strided_slice %20 {offsets = [0, 0], sizes = [8, 128], strides = [1, 1]} : vector<8x512xbf16> to vector<8x128xbf16>
    %24 = vector.extract_strided_slice %20 {offsets = [0, 256], sizes = [8, 128], strides = [1, 1]} : vector<8x512xbf16> to vector<8x128xbf16>
    %cst_19 = arith.constant dense<0.000000e+00> : vector<4x8xf32>
    %25 = tpu.matmul %22, %23, %cst_19 {dimension_numbers = #tpu.dot_dimension_numbers<[1], [1], [0], [0], [0, 0, 1, 0], [], []>} : vector<4x128xbf16>, vector<8x128xbf16>, vector<4x8xf32> -> vector<4x8xf32>
    %cst_20 = arith.constant dense<0xFF800000> : vector<4xf32>
    %26 = vector.multi_reduction <maximumf>, %25, %cst_20 [1] : vector<4x8xf32> to vector<4xf32>
    %27 = vector.shape_cast %26 : vector<4xf32> to vector<4x1xf32>
    %28 = vector.broadcast %27 : vector<4x1xf32> to vector<4x8xf32>
    %29 = arith.subf %25, %28 : vector<4x8xf32>
    %30 = math.exp %29 : vector<4x8xf32>
    %cst_21 = arith.constant dense<0.000000e+00> : vector<4xf32>
    %31 = vector.multi_reduction <add>, %30, %cst_21 [1] : vector<4x8xf32> to vector<4xf32>
    %32 = vector.shape_cast %31 : vector<4xf32> to vector<4x1xf32>
    %33 = tpu.reciprocal %32 {approx = true} : vector<4x1xf32> -> vector<4x1xf32>
    %34 = vector.broadcast %33 : vector<4x1xf32> to vector<4x8xf32>
    %35 = arith.mulf %30, %34 : vector<4x8xf32>
    %36 = arith.truncf %35 : vector<4x8xf32> to vector<4x8xbf16>
    %cst_22 = arith.constant dense<0.000000e+00> : vector<4x128xf32>
    %37 = tpu.matmul %36, %24, %cst_22 {dimension_numbers = #tpu.dot_dimension_numbers<[1], [0], [0], [1], [0, 0, 1, 1], [], []>} : vector<4x8xbf16>, vector<8x128xbf16>, vector<4x128xf32> -> vector<4x128xf32>
    %c0_23 = arith.constant 0 : index
    %c0_24 = arith.constant 0 : index
    %38 = vector.load %arg10[%c0_23, %c0_24] : memref<4x256xf32, #tpu.memory_space<vmem>>, vector<4x128xf32>
    tpu.vector_store %arg10[%c0_23, %c0_24], %37 {strides = array<i32>} : memref<4x256xf32, #tpu.memory_space<vmem>>, vector<4x128xf32>,
    %c0_25 = arith.constant 0 : index
    %c128 = arith.constant 128 : index
    %39 = vector.load %arg9[%c0_25, %c128] : memref<4x256xf32, #tpu.memory_space<vmem>>, vector<4x128xf32>
    %40 = arith.truncf %39 : vector<4x128xf32> to vector<4x128xbf16>
    %41 = vector.extract_strided_slice %20 {offsets = [0, 128], sizes = [8, 128], strides = [1, 1]} : vector<8x512xbf16> to vector<8x128xbf16>
    %42 = vector.extract_strided_slice %20 {offsets = [0, 384], sizes = [8, 128], strides = [1, 1]} : vector<8x512xbf16> to vector<8x128xbf16>
    %cst_26 = arith.constant dense<0.000000e+00> : vector<4x8xf32>
    %43 = tpu.matmul %40, %41, %cst_26 {dimension_numbers = #tpu.dot_dimension_numbers<[1], [1], [0], [0], [0, 0, 1, 0], [], []>} : vector<4x128xbf16>, vector<8x128xbf16>, vector<4x8xf32> -> vector<4x8xf32>
    %cst_27 = arith.constant dense<0xFF800000> : vector<4xf32>
    %44 = vector.multi_reduction <maximumf>, %43, %cst_27 [1] : vector<4x8xf32> to vector<4xf32>
    %45 = vector.shape_cast %44 : vector<4xf32> to vector<4x1xf32>
    %46 = vector.broadcast %45 : vector<4x1xf32> to vector<4x8xf32>
    %47 = arith.subf %43, %46 : vector<4x8xf32>
    %48 = math.exp %47 : vector<4x8xf32>
    %cst_28 = arith.constant dense<0.000000e+00> : vector<4xf32>
    %49 = vector.multi_reduction <add>, %48, %cst_28 [1] : vector<4x8xf32> to vector<4xf32>
    %50 = vector.shape_cast %49 : vector<4xf32> to vector<4x1xf32>
    %51 = tpu.reciprocal %50 {approx = true} : vector<4x1xf32> -> vector<4x1xf32>
    %52 = vector.broadcast %51 : vector<4x1xf32> to vector<4x8xf32>
    %53 = arith.mulf %48, %52 : vector<4x8xf32>
    %54 = arith.truncf %53 : vector<4x8xf32> to vector<4x8xbf16>
    %cst_29 = arith.constant dense<0.000000e+00> : vector<4x128xf32>
    %55 = tpu.matmul %54, %42, %cst_29 {dimension_numbers = #tpu.dot_dimension_numbers<[1], [0], [0], [1], [0, 0, 1, 1], [], []>} : vector<4x8xbf16>, vector<8x128xbf16>, vector<4x128xf32> -> vector<4x128xf32>
    %c0_30 = arith.constant 0 : index
    %c128_31 = arith.constant 128 : index
    %56 = vector.load %arg10[%c0_30, %c128_31] : memref<4x256xf32, #tpu.memory_space<vmem>>, vector<4x128xf32>
    tpu.vector_store %arg10[%c0_30, %c128_31], %55 {strides = array<i32>} : memref<4x256xf32, #tpu.memory_space<vmem>>, vector<4x128xf32>,
    %c0_32 = arith.constant 0 : index
    %c0_33 = arith.constant 0 : index
    %57 = vector.load %arg10[%c0_32, %c0_33] : memref<4x256xf32, #tpu.memory_space<vmem>>, vector<4x256xf32>
    %cst_34 = arith.constant dense<0.000000e+00> : vector<4xf32>
    %58 = vector.multi_reduction <add>, %57, %cst_34 [1] : vector<4x256xf32> to vector<4xf32>
    %59 = vector.shape_cast %58 : vector<4xf32> to vector<4x1xf32>
    %cst_35 = arith.constant 2.560000e+02 : f32
    %60 = vector.broadcast %cst_35 : f32 to vector<4x1xf32>
    %61 = arith.divf %59, %60 : vector<4x1xf32>
    %62 = vector.broadcast %61 : vector<4x1xf32> to vector<4x256xf32>
    %63 = arith.subf %57, %62 : vector<4x256xf32>
    %64 = arith.mulf %63, %63 : vector<4x256xf32>
    %cst_36 = arith.constant dense<0.000000e+00> : vector<4xf32>
    %65 = vector.multi_reduction <add>, %64, %cst_36 [1] : vector<4x256xf32> to vector<4xf32>
    %66 = vector.shape_cast %65 : vector<4xf32> to vector<4x1xf32>
    %cst_37 = arith.constant 2.560000e+02 : f32
    %67 = vector.broadcast %cst_37 : f32 to vector<4x1xf32>
    %68 = arith.divf %66, %67 : vector<4x1xf32>
    %69 = vector.broadcast %61 : vector<4x1xf32> to vector<4x256xf32>
    %70 = arith.subf %57, %69 : vector<4x256xf32>
    %cst_38 = arith.constant 9.99999974E-6 : f32
    %71 = vector.broadcast %cst_38 : f32 to vector<4x1xf32>
    %72 = arith.addf %68, %71 : vector<4x1xf32>
    %73 = math.rsqrt %72 : vector<4x1xf32>
    %74 = vector.broadcast %73 : vector<4x1xf32> to vector<4x256xf32>
    %75 = arith.mulf %70, %74 : vector<4x256xf32>
    %76 = arith.truncf %75 : vector<4x256xf32> to vector<4x256xbf16>
    %c0_39 = arith.constant 0 : index
    %c0_40 = arith.constant 0 : index
    %77 = vector.load %arg6[%c0_39, %c0_40] : memref<256x256xbf16, #tpu.memory_space<vmem>>, vector<256x256xbf16>
    %cst_41 = arith.constant dense<0.000000e+00> : vector<4x256xf32>
    %78 = tpu.matmul %76, %77, %cst_41 {dimension_numbers = #tpu.dot_dimension_numbers<[1], [0], [0], [1], [0, 0, 1, 1], [], []>} : vector<4x256xbf16>, vector<256x256xbf16>, vector<4x256xf32> -> vector<4x256xf32>
    %c0_42 = arith.constant 0 : index
    %c0_43 = arith.constant 0 : index
    %79 = vector.load %arg7[%c0_42, %c0_43] : memref<1x256xf32, #tpu.memory_space<vmem>>, vector<1x256xf32>
    %80 = vector.broadcast %79 : vector<1x256xf32> to vector<4x256xf32>
    %81 = arith.addf %78, %80 : vector<4x256xf32>
    %c0_44 = arith.constant 0 : index
    %c0_45 = arith.constant 0 : index
    %c0_46 = arith.constant 0 : index
    %82 = vector.load %arg8[%c0_44, %c0_45, %c0_46] : memref<1x4x256xf32, #tpu.memory_space<vmem>>, vector<1x4x256xf32>
    %83 = vector.shape_cast %82 : vector<1x4x256xf32> to vector<4x256xf32>
    %84 = vector.shape_cast %81 : vector<4x256xf32> to vector<1x4x256xf32>
    tpu.vector_store %arg8[%c0_44, %c0_45, %c0_46], %84 {strides = array<i32>} : memref<1x4x256xf32, #tpu.memory_space<vmem>>, vector<1x4x256xf32>,
    return
  }
  func.func @transform_0(%arg0: i32) -> (i32, i32, i32) {
    %c0_i32 = arith.constant 0 : i32
    %c0_i32_0 = arith.constant 0 : i32
    %c0_i32_1 = arith.constant 0 : i32
    return %arg0, %c0_i32, %c0_i32_0 : i32, i32, i32
  }
  func.func @transform_1(%arg0: i32) -> (i32, i32) {
    %c0_i32 = arith.constant 0 : i32
    %c0_i32_0 = arith.constant 0 : i32
    %c0_i32_1 = arith.constant 0 : i32
    return %c0_i32, %c0_i32_0 : i32, i32
  }
  func.func @transform_2(%arg0: i32) -> (i32, i32) {
    %c0_i32 = arith.constant 0 : i32
    %c0_i32_0 = arith.constant 0 : i32
    %c0_i32_1 = arith.constant 0 : i32
    return %c0_i32, %c0_i32_0 : i32, i32
  }
  func.func @transform_3(%arg0: i32) -> (i32, i32, i32) {
    %c0_i32 = arith.constant 0 : i32
    %c0_i32_0 = arith.constant 0 : i32
    %c0_i32_1 = arith.constant 0 : i32
    return %arg0, %c0_i32, %c0_i32_0 : i32, i32, i32
  }
  func.func @transform_4(%arg0: i32) -> (i32, i32) {
    %c0_i32 = arith.constant 0 : i32
    %c0_i32_0 = arith.constant 0 : i32
    %c0_i32_1 = arith.constant 0 : i32
    return %c0_i32, %c0_i32_0 : i32, i32
  }
  func.func @transform_5(%arg0: i32) -> (i32, i32) {
    %c0_i32 = arith.constant 0 : i32
    %c0_i32_0 = arith.constant 0 : i32
    %c0_i32_1 = arith.constant 0 : i32
    return %c0_i32, %c0_i32_0 : i32, i32
  }
  func.func @transform_6(%arg0: i32) -> (i32, i32) {
    %c0_i32 = arith.constant 0 : i32
    %c0_i32_0 = arith.constant 0 : i32
    %c0_i32_1 = arith.constant 0 : i32
    return %c0_i32, %c0_i32_0 : i32, i32
  }
  func.func @transform_7(%arg0: i32) -> (i32, i32, i32) {
    %c0_i32 = arith.constant 0 : i32
    %c0_i32_0 = arith.constant 0 : i32
    %c0_i32_1 = arith.constant 0 : i32
    return %arg0, %c0_i32, %c0_i32_0 : i32, i32, i32
  }
}

</mosaic_0001>

<bundles_post_ra>
// kernel: tpu_custom_call.1
= control target key start
LH: loop header
LB: loop body
LE: loop exit
PB: predicated region body
PF: predicated region fallthrough
CT: control target
= control target key end

     0   :  { %s3033_s0 = inlined_call_operand.hbm [shape: f32[2,1,32], index: 0, kind: input, shape index: {}]   ;;  %s3034_s1 = inlined_call_operand.hbm [shape: bf16[32,1024], index: 1, kind: input, shape index: {}]   ;;  %s3035_s2 = inlined_call_operand.hbm [shape: f32[1,1024], index: 2, kind: input, shape index: {}]   ;;  %s3036_s3 = inlined_call_operand.hbm [shape: f32[2,8,256], index: 3, kind: input, shape index: {}]   ;;  %s3037_s4 = inlined_call_operand.hbm [shape: bf16[256,512], index: 4, kind: input, shape index: {}]   ;;  %s3038_s5 = inlined_call_operand.hbm [shape: bf16[256,256], index: 5, kind: input, shape index: {}]   ;;  %s3039_s6 = inlined_call_operand.vmem [shape: f32[1,256], index: 6, kind: input, shape index: {}]   ;;  %s3040_s7 = inlined_call_operand.hbm [shape: f32[2,4,256], index: 7, kind: output, shape index: {}]  }
   0x1   :  { %3042 = sst [smem:[#allocation24_spill]] %s3034_s1 }
   0x2   :  { %3043 = sst [smem:[#allocation25_spill]] %s3035_s2 }
   0x3   :  { %3044 = sst [smem:[#allocation26_spill]] %s3037_s4 }
   0x4   :  { %3045 = sst [smem:[#allocation27_spill]] %s3038_s5 }
   0x5   :  { %12 = vsyncpa [#allocation5], 0 }
   0x6   :  { %14 = vsyncpa [#allocation5 + $0x1], 0 }
   0x7   :  { %15 = vsyncpa [#allocation8], 0 }
   0x8   :  { %16 = vsyncpa [#allocation11], 0 }
   0x9   :  { %18 = vsyncpa [#allocation11 + $0x1], 0 }
   0xa   :  { %19 = vsyncpa [#allocation14], 0 }
   0xb   :  { %20 = vsyncpa [#allocation6], 0 }
   0xc   :  { %22 = vsyncpa [#allocation6 + $0x1], 0  ;;  %s2739_s24 = smov 0   ;;  %s2741_s25 = smov 0  }
   0xd   :  { %s2743_s26 = smov 0   ;;  %s2745_s27 = smov 0  }
   0xe LB: > { %3046 = sst [smem:[#allocation22_spill]] %s2681_s26  ;;  %s2763_s8 = sadd.s32 4294967295, %s2685_s27   ;;  %s2685_s27 = sphi %s2745_s27, %s3066_s27   ;;  %s2681_s26 = sphi %s2743_s26, %s3063_s26   ;;  %s2677_s25 = sphi %s2741_s25, %s3065_s25   ;;  %s2673_s24 = sphi %s2739_s24, %s3064_s24  }
   0xf   : > { %s3047_s1 = sld [smem:[#allocation24_spill]]  ;;  %p1718_p0 = scmp.ge.s32.totalorder %s2685_s27, 1 }
  0x10   : > { %p49_p1 = scmp.eq.s32.totalorder %s2763_s8, 0  ;;  %p216_p2 = scmp.lt.s32.totalorder %s2685_s27, 3 }
  0x11   : > { %s2687_s10 = smov [#allocation7]   ;;  %s3049_s4 = sld [smem:[#allocation26_spill]] }
  0x12   : > { %p2768_p3 = pnand %p1718_p0, %p216_p2  ;;  %s229_s11 = sshll.u32 %s2687_s10, 4  ;;  %s230_s11 = int_to_ptr.vmem [resolvable:$true] %s229_s11 }
  0x13   : > { %s2688_s16 = smov [#allocation12]   ;;  %s2689_s18 = smov 512  }
  0x14   : > { %p2333_p4 = pneg %p2768_p3  ;;  %s255_s17 = sshll.u32 %s2688_s16, 4  ;;  %s256_s17 = int_to_ptr.vmem [resolvable:$true] %s255_s17 }
  0x15   : > { %s227_s30 = sshll.u32 %s3047_s1, 4  ;;  %s2690_s19 = smov 32   ;;  %s228_s30 = int_to_ptr.hbm [resolvable:$true] %s227_s30 }
  0x16   : > { %p2780_p6 = pnand %p2333_p4, %p49_p1  ;;  %s2691_s20 = smov 256  }
  0x17   : > { %s253_s14 = sshll.u32 %s3049_s4, 4  ;;  %s2692_s21 = smov 16   ;;  %s254_s14 = int_to_ptr.hbm [resolvable:$true] %s253_s14 }
  0x18   : > { %2336 = dma.hbm_to_vmem [thread:$0]  (!%p2780_p6), %s228_s30, 2048, %s230_s11, [#allocation8], %s2689_s18, %s2689_s18, %s2690_s19  }
  0x19   : > { %2342 = dma.hbm_to_vmem [thread:$0]  (!%p2780_p6), %s254_s14, 8192, %s256_s17, [#allocation11], %s2691_s20, %s2691_s20, %s2692_s21  }
  0x1a   : > { %s3051_s2 = sld [smem:[#allocation25_spill]]  ;;  %s2693_s29 = smov [#allocation9]  }
  0x1b   : > { %s244_s10 = sshll.u32 %s2693_s29, 4  ;;  %s3052_s5 = sld [smem:[#allocation27_spill]]  ;;  %s245_s10 = int_to_ptr.vmem [resolvable:$true] %s244_s10 }
  0x1c   : > { %s2694_s13 = smov [#allocation13]   ;;  %s2695_s16 = smov 128  }
  0x1d   : > { %s269_s14 = sshll.u32 %s2694_s13, 4  ;;  %s2696_s17 = smov 8   ;;  %s270_s14 = int_to_ptr.vmem [resolvable:$true] %s269_s14 }
  0x1e   : > { %s1717_s18 = sadd.s32 4294967294, %s2685_s27   ;;  %s2800_s19 = sadd.s32 1, %s2685_s27  }
  0x1f   : > { %s32_s20 = ssub.s32 %s2685_s27, %s2800_s19  ;;  %s35_s21 = sadd.s32 1, %s2681_s26 }
  0x20   : > { %s242_s28 = sshll.u32 %s3051_s2, 4  ;;  %p33_p7 = scmp.eq.s32.totalorder %s32_s20, 0  ;;  %s243_s28 = int_to_ptr.hbm [resolvable:$true] %s242_s28 }
  0x21   : > { %s267_s12 = sshll.u32 %s3052_s5, 4  ;;  %p42_p8 = scmp.ne.s32.totalorder %s2681_s26, %s2677_s25  ;;  %s268_s12 = int_to_ptr.hbm [resolvable:$true] %s267_s12 }
  0x22   : > { %2339 = dma.hbm_to_vmem [thread:$0]  (!%p2780_p6), %s243_s28, 128, %s245_s10, [#allocation8]  }
  0x23   : > { %2345 = dma.hbm_to_vmem [thread:$0]  (!%p2780_p6), %s268_s12, 4096, %s270_s14, [#allocation14], %s2695_s16, %s2695_s16, %s2696_s17  }
  0x24   : > { %p43_p9 = scmp.eq.s32.totalorder %s2685_s27, 0  ;;  %p48_p10 = scmp.ne.s32.totalorder %s2677_s25, %s2673_s24 }
  0x25   : > { %s2811_s22 = scalar_select %p33_p7, %s2681_s26, %s35_s21  }
  0x26   : > { %p2813_p11 = por %p43_p9, %p42_p8  ;;  %p2819_p12 = por %p49_p1, %p48_p10 }
  0x27   : > { %3053 = sst [smem:[#allocation23_spill]] %s2811_s22  ;;  %p203_p13 = scmp.eq.s32.totalorder %s2763_s8, 1 }
  0x28   : > { %p209_p0 = scmp.eq.s32.totalorder %s1717_s18, 1  ;;  %p2361_p2 = scmp.lt.s32.totalorder %s2685_s27, 2 }
  0x29   : > { %s2826_s28 = sand.u32 1, %s2681_s26   ;;  %p2828_p4 = por %p203_p13, %p42_p8 }
  0x2a   : > { %p2832_p6 = por %p209_p0, %p48_p10  ;;  %s292_s12 = scalar_lea.hbm %s3033_s0, %s2685_s27 }
  0x2b   : > { %s289_s13 = scalar_lea.vmem [#allocation4], %s2826_s28  ;;  %s294_s16 = sshll.u32 %s292_s12, 4  ;;  %s295_s16 = int_to_ptr.hbm [resolvable:$true] %s294_s16 }
  0x2c   : > { %s296_s14 = sshll.u32 %s289_s13, 4  ;;  %p2843_p7 = pnand %p2361_p2, %p2813_p11  ;;  %s297_s14 = int_to_ptr.vmem [resolvable:$true] %s296_s14 }
  0x2d   : > { %s303_s18 = sand.u32 1, %s2685_s27   ;;  %s1724_s20 = sshll.u32 %s2826_s28, 4 }
  0x2e   : > { %s287_s21 = scalar_lea.sflag [#allocation5], %s2826_s28  ;;  %s2543_s1 = sshra.s32 %s295_s16, 4  ;;  %s2544_s1 = int_to_ptr.hbm [resolvable:$true] %s2543_s1 }
  0x2f   : > { %s2545_s2 = scalar_lea.hbm %s2544_s1, 1  ;;  %p2547_p9 = pneg %p2843_p7 }
  0x30   : > { %p2546_p8 = scmp.ne.s32.totalorder %s2544_s1, %s2545_s2  ;;  %s2550_s11 = scalar_lea.hbm %s3033_s0, 2 }
  0x31   : > { %p2551_p11 = scmp.lt.s32.totalorder %s2544_s1, %s3033_s0  ;;  %p2552_p0 = scmp.lt.s32.totalorder %s2550_s11, %s2545_s2 }
  0x32   : > { %p2548_p10 = pnand %p2547_p9, %p2546_p8 }
  0x33   : > { %p2553_p2 = por %p2552_p0, %p2551_p11 }
  0x34   : > { %p2549_p13 = pneg %p2548_p10 }
  0x36   : > { %p2554_p5 = pnand %p2553_p2, %p2549_p13 }
  0x38   : > { %2557 = shalt.err (!%p2554_p5)
}
  0x39   : > { %2349 = dma.hbm_to_vmem [thread:$0]  (!%p2843_p7), %s295_s16, 16, %s297_s14, %s287_s21  }
  0x3a   : > { %s2197_s28 = sshll.u32 %s2685_s27, 4  ;;  %s307_s23 = scalar_lea.vmem [#allocation10], %s1724_s20 }
  0x3b   : > { %s312_s22 = scalar_lea.hbm %s3036_s3, %s2197_s28  ;;  %s316_s30 = sshll.u32 %s307_s23, 4  ;;  %s317_s30 = int_to_ptr.vmem [resolvable:$true] %s316_s30 }
  0x3c   : > { %s314_s26 = sshll.u32 %s312_s22, 4  ;;  %s304_s1 = scalar_lea.sflag [#allocation11], %s303_s18  ;;  %s315_s26 = int_to_ptr.hbm [resolvable:$true] %s314_s26 }
  0x3d   : > { %s2573_s2 = sshra.s32 %s315_s26, 4  ;;  %s2580_s21 = scalar_lea.hbm %s3036_s3, 32  ;;  %s2574_s2 = int_to_ptr.hbm [resolvable:$true] %s2573_s2 }
  0x3e   : > { %s2575_s11 = scalar_lea.hbm %s2574_s2, 16  ;;  %p2581_p13 = scmp.lt.s32.totalorder %s2574_s2, %s3036_s3 }
  0x3f   : > { %p2576_p5 = scmp.ne.s32.totalorder %s2574_s2, %s2575_s11  ;;  %p2582_p11 = scmp.lt.s32.totalorder %s2580_s21, %s2575_s11 }
  0x41   : > { %p2578_p8 = pnand %p2576_p5, %p2547_p9  ;;  %p2583_p0 = por %p2582_p11, %p2581_p13 }
  0x43   : > { %p2579_p10 = pneg %p2578_p8 }
  0x45   : > { %p2584_p2 = pnand %p2583_p0, %p2579_p10 }
  0x47   : > { %2587 = shalt.err (!%p2584_p2)
}
  0x48   : > { %2352 = dma.hbm_to_vmem [thread:$0]  (!%p2843_p7), %s315_s26, 256, %s317_s30, %s304_s1  }
  0x49   : > { %325 = sbr.rel (%p2768_p3) target bundleno = 1259 (0x4eb), region = 48  ;;  %s2881_s22 = sand.u32 (!%p2768_p3), 1, %s2677_s25  }
  0x4a   : > { %s328_s18 = scalar_lea.sflag (!%p2768_p3), [#allocation5], %s2881_s22  ;;  %s330_s20 = scalar_lea.vmem (!%p2768_p3), [#allocation4], %s2881_s22 }
  0x4e   : > { %2648 = dma.done.wait (%p2819_p12), %s328_s18, 16  }
  0x4f   : > { %2650 = vsyncadd (%p2819_p12), %s328_s18, 4294967280 }
  0x50   : > { %2652 = dma.done.wait (%p49_p1), [#allocation8], 2176  }
  0x51   : > { %2654 = vsyncadd (%p49_p1), [#allocation8], 4294965120  ;;  %s346_s26 = sand.u32 1, %s2763_s8   ;;  %s1730_s9 = sshll.u32 %s2881_s22, 4 }
  0x52   : > { %s347_s17 = scalar_lea.sflag [#allocation11], %s346_s26  ;;  %s2895_s12 = scalar_lea.vmem [#allocation10], %s1730_s9 }
  0x53   : > { %2656 = dma.done.wait (%p2819_p12), %s347_s17, 256  }
  0x54   : > { %2658 = vsyncadd (%p2819_p12), %s347_s17, 4294967040 }
  0x55   : > { %2660 = dma.done.wait (%p49_p1), [#allocation11], 8192  }
  0x56   : > { %2662 = vsyncadd (%p49_p1), [#allocation11], 4294959104 }
  0x57   : > { %2664 = dma.done.wait (%p49_p1), [#allocation14], 4096  }
  0x58   : > { %2666 = vsyncadd (%p49_p1), [#allocation14], 4294963200  ;;  %v1768_v0 = vld [vmem:[#allocation7 + $0x40] sm:$0xf]  ;;  %v2206_v2 = vld [vmem:[#allocation7 + $0x44] sm:$0xf] }
  0x59   : > { %v2210_v1 = vld [vmem:[#allocation7 + $0x5c] sm:$0xf0]  ;;  %vm513_vm0 = vcmask 261120   ;;  %v1770_v4 = vld [vmem:[#allocation7 + $0x60] sm:$0xf0]  ;;  %vm624_vm1 = vcmask 1040384  }
  0x5a   : > { %v1769_v3 = vor.u32 %v2210_v1, %v1768_v0  ;;  %v1776_v5 = vld [vmem:[#allocation7 + $0x48] sm:$0xf]  ;;  %v1773_v7 = vor.u32 %v2206_v2, %v1770_v4  ;;  %v2207_v9 = vld [vmem:[#allocation7 + $0x4c] sm:$0xf]  ;;  %v1736_v11 = vld [vmem:[#allocation7] sm:$0xf] }
  0x5b   : > { %v2211_v6 = vld [vmem:[#allocation7 + $0x64] sm:$0xf0]  ;;  %v1778_v10 = vld [vmem:[#allocation7 + $0x68] sm:$0xf0]  ;;  %v2202_v13 = vld [vmem:[#allocation7 + $0x1c] sm:$0xf0] }
  0x5c   : > { %v1777_v8 = vor.u32 %v2211_v6, %v1776_v5  ;;  %523 = vmatpush.bf16.msra.mxu0 %v1769_v3  ;;  %v1781_v12 = vor.u32 %v2207_v9, %v1778_v10  ;;  %v2198_v14 = vld [vmem:[#allocation7 + $0x4] sm:$0xf]  ;;  %536 = vmatpush.bf16.msra.mxu1 %v1773_v7  ;;  %v1737_v16 = vor.u32 %v2202_v13, %v1736_v11  ;;  %v1744_v18 = vld [vmem:[#allocation7 + $0x8] sm:$0xf]  ;;  %v2199_v20 = vld [vmem:[#allocation7 + $0xc] sm:$0xf] }
  0x5d   : > { %v1738_v15 = vld [vmem:[#allocation7 + $0x20] sm:$0xf0]  ;;  %v2203_v19 = vld [vmem:[#allocation7 + $0x24] sm:$0xf0]  ;;  %v1746_v22 = vld [vmem:[#allocation7 + $0x28] sm:$0xf0] }
  0x5e   : > { %549 = vmatpush.bf16.msra.mxu2 %v1777_v8  ;;  %v1741_v17 = vor.u32 %v2198_v14, %v1738_v15  ;;  %562 = vmatpush.bf16.msra.mxu3 %v1781_v12  ;;  %v1745_v21 = vor.u32 %v2203_v19, %v1744_v18  ;;  %v1784_v23 = vld [vmem:[#allocation7 + $0x50] sm:$0xf]  ;;  %v1749_v25 = vor.u32 %v2199_v20, %v1746_v22  ;;  %v2208_v27 = vld [vmem:[#allocation7 + $0x54] sm:$0xf]  ;;  %v1792_v29 = vld [vmem:[#allocation7 + $0x58] sm:$0xf] }
  0x5f   : > { %v2212_v24 = vld [vmem:[#allocation7 + $0x6c] sm:$0xf0]  ;;  %v1786_v28 = vld [vmem:[#allocation7 + $0x70] sm:$0xf0]  ;;  %v2213_v31 = vld [vmem:[#allocation7 + $0x74] sm:$0xf0] }
  0x60   : > { %v1785_v26 = vor.u32 %v2212_v24, %v1784_v23  ;;  %524 = vmatpush.bf16.msra.mxu0 %v1737_v16  ;;  %v1789_v30 = vor.u32 %v2208_v27, %v1786_v28  ;;  %v2209_v32 = vld [vmem:[#allocation7 + $0x5c] sm:$0xf]  ;;  %537 = vmatpush.bf16.msra.mxu1 %v1741_v17  ;;  %v1793_v34 = vor.u32 %v2213_v31, %v1792_v29  ;;  %v397_v36 = vld [vmem:[%s330_s20] sm:$0x1]  ;;  %v1752_v37 = vld [vmem:[#allocation7 + $0x10] sm:$0xf] }
  0x61   : > { %v1794_v33 = vld [vmem:[#allocation7 + $0x78] sm:$0xf0]  ;;  %v2204_v38 = vld [vmem:[#allocation7 + $0x2c] sm:$0xf0]  ;;  %v2911_v39 = vpack.c.bf16 %v397_v36, %v397_v36  ;;  %v2200_v41 = vld [vmem:[#allocation7 + $0x14] sm:$0xf] }
  0x62   : > { %550 = vmatpush.bf16.msra.mxu2 %v1745_v21  ;;  %v1797_v35 = vor.u32 %v2209_v32, %v1794_v33  ;;  %563 = vmatpush.bf16.msra.mxu3 %v1749_v25  ;;  %v1753_v40 = vor.u32 %v2204_v38, %v1752_v37  ;;  %v1754_v42 = vld [vmem:[#allocation7 + $0x30] sm:$0xf0]  ;;  %v1760_v43 = vld [vmem:[#allocation7 + $0x18] sm:$0xf]  ;;  %v2201_v46 = vld [vmem:[#allocation7 + $0x1c] sm:$0xf] }
  0x63   : > { %v1757_v44 = vor.u32 %v2200_v41, %v1754_v42  ;;  %v2205_v45 = vld [vmem:[#allocation7 + $0x34] sm:$0xf0]  ;;  %v1762_v47 = vld [vmem:[#allocation7 + $0x38] sm:$0xf0]  ;;  %1798 = vmatmul.msk.bf16.vlgmr.msra.gmra.mxu0 %vm513_vm0, %v2911_v39  ;;  %v1920_v50 = vld [vmem:[#allocation12 + $0xe0] sm:$0xf]  ;;  %1799 = vmatmul.msk.bf16.vlgmr.msra.gmra.mxu1 %vm513_vm0, %v2911_v39 }
  0x64   : > { %575 = vmatpush.bf16.msrb.mxu0 %v1785_v26  ;;  %588 = vmatpush.bf16.msrb.mxu1 %v1789_v30  ;;  %v1761_v48 = vor.u32 %v2205_v45, %v1760_v43  ;;  %v1765_v49 = vor.u32 %v2201_v46, %v1762_v47  ;;  %v2244_v51 = vld [vmem:[#allocation12 + $0xec] sm:$0xf0]  ;;  %v2048_v52 = vld [vmem:[#allocation12 + $0x1e0] sm:$0xf]  ;;  %v2242_v55 = vld [vmem:[#allocation12 + $0xe4] sm:$0xf] }
  0x65   : > { %1800 = vmatmul.msk.bf16.vlgmr.msra.gmra.mxu2 %vm513_vm0, %v2911_v39  ;;  %v1921_v53 = vor.u32 %v2244_v51, %v1920_v50  ;;  %v2276_v54 = vld [vmem:[#allocation12 + $0x1ec] sm:$0xf0]  ;;  %v1922_v56 = vld [vmem:[#allocation12 + $0xf0] sm:$0xf0]  ;;  %1801 = vmatmul.msk.bf16.vlgmr.msra.gmra.mxu3 %vm513_vm0, %v2911_v39  ;;  %v2274_v59 = vld [vmem:[#allocation12 + $0x1e4] sm:$0xf] }
  0x66   : > { %601 = vmatpush.bf16.msrb.mxu2 %v1793_v34  ;;  %614 = vmatpush.bf16.msrb.mxu3 %v1797_v35  ;;  %v2049_v57 = vor.u32 %v2276_v54, %v2048_v52  ;;  %v1925_v58 = vor.u32 %v2242_v55, %v1922_v56  ;;  %v2050_v60 = vld [vmem:[#allocation12 + $0x1f0] sm:$0xf0]  ;;  %v1904_v61 = vld [vmem:[#allocation12 + $0xc0] sm:$0xf]  ;;  %v2240_v63 = vld [vmem:[#allocation12 + $0xcc] sm:$0xf0] }
  0x67   : > { %v2053_v62 = vor.u32 %v2274_v59, %v2050_v60  ;;  %v2032_v0 = vld [vmem:[#allocation12 + $0x1c0] sm:$0xf]  ;;  %v2272_v1 = vld [vmem:[#allocation12 + $0x1cc] sm:$0xf0]  ;;  %v1905_v2 = vor.u32 %v2240_v63, %v1904_v61  ;;  %v2238_v3 = vld [vmem:[#allocation12 + $0xc4] sm:$0xf] }
  0x68   : > { %576 = vmatpush.bf16.msrb.mxu0 %v1753_v40  ;;  %589 = vmatpush.bf16.msrb.mxu1 %v1757_v44  ;;  %v1906_v4 = vld [vmem:[#allocation12 + $0xd0] sm:$0xf0]  ;;  %v2270_v5 = vld [vmem:[#allocation12 + $0x1c4] sm:$0xf]  ;;  %v2033_v6 = vor.u32 %v2272_v1, %v2032_v0  ;;  %v1888_v9 = vld [vmem:[#allocation12 + $0xa0] sm:$0xf] }
  0x69   : > { %v1909_v7 = vor.u32 %v2238_v3, %v1906_v4  ;;  %v2034_v8 = vld [vmem:[#allocation12 + $0x1d0] sm:$0xf0]  ;;  %v2236_v10 = vld [vmem:[#allocation12 + $0xac] sm:$0xf0]  ;;  %v2016_v12 = vld [vmem:[#allocation12 + $0x1a0] sm:$0xf] }
  0x6a   : > { %602 = vmatpush.bf16.msrb.mxu2 %v1761_v48  ;;  %615 = vmatpush.bf16.msrb.mxu3 %v1765_v49  ;;  %v2037_v11 = vor.u32 %v2270_v5, %v2034_v8  ;;  %v2268_v13 = vld [vmem:[#allocation12 + $0x1ac] sm:$0xf0]  ;;  %v2234_v14 = vld [vmem:[#allocation12 + $0xa4] sm:$0xf]  ;;  %v1890_v15 = vld [vmem:[#allocation12 + $0xb0] sm:$0xf0]  ;;  %v1889_v18 = vor.u32 %v2236_v10, %v1888_v9 }
  0x6b   : > { %v2266_v16 = vld [vmem:[#allocation12 + $0x1a4] sm:$0xf]  ;;  %v2018_v17 = vld [vmem:[#allocation12 + $0x1b0] sm:$0xf0]  ;;  %v2017_v19 = vor.u32 %v2268_v13, %v2016_v12  ;;  %v1893_v20 = vor.u32 %v2234_v14, %v1890_v15  ;;  %v1872_v21 = vld [vmem:[#allocation12 + $0x80] sm:$0xf] }
  0x6c   : > { %1041 = vmatpush.bf16.msra.mxu0 %v1921_v53  ;;  %1054 = vmatpush.bf16.msra.mxu1 %v2049_v57  ;;  %v2232_v22 = vld [vmem:[#allocation12 + $0x8c] sm:$0xf0]  ;;  %v2000_v23 = vld [vmem:[#allocation12 + $0x180] sm:$0xf]  ;;  %v2021_v24 = vor.u32 %v2266_v16, %v2018_v17  ;;  %v2230_v26 = vld [vmem:[#allocation12 + $0x84] sm:$0xf] }
  0x6d   : > { %v2264_v25 = vld [vmem:[#allocation12 + $0x18c] sm:$0xf0]  ;;  %v1874_v27 = vld [vmem:[#allocation12 + $0x90] sm:$0xf0]  ;;  %v2262_v28 = vld [vmem:[#allocation12 + $0x184] sm:$0xf]  ;;  %v1873_v30 = vor.u32 %v2232_v22, %v1872_v21 }
  0x6e   : > { %1067 = vmatpush.bf16.msra.mxu2 %v1925_v58  ;;  %1080 = vmatpush.bf16.msra.mxu3 %v2053_v62  ;;  %v2002_v29 = vld [vmem:[#allocation12 + $0x190] sm:$0xf0]  ;;  %v2001_v31 = vor.u32 %v2264_v25, %v2000_v23  ;;  %v1877_v32 = vor.u32 %v2230_v26, %v1874_v27  ;;  %v1856_v33 = vld [vmem:[#allocation12 + $0x60] sm:$0xf]  ;;  %v2228_v34 = vld [vmem:[#allocation12 + $0x6c] sm:$0xf0] }
  0x6f   : > { %v1984_v35 = vld [vmem:[#allocation12 + $0x160] sm:$0xf]  ;;  %v2005_v36 = vor.u32 %v2262_v28, %v2002_v29  ;;  %v2260_v37 = vld [vmem:[#allocation12 + $0x16c] sm:$0xf0]  ;;  %v2226_v38 = vld [vmem:[#allocation12 + $0x64] sm:$0xf]  ;;  %v1857_v43 = vor.u32 %v2228_v34, %v1856_v33 }
  0x70   : > { %1042 = vmatpush.bf16.msra.mxu0 %v1905_v2  ;;  %1055 = vmatpush.bf16.msra.mxu1 %v2033_v6  ;;  %v1858_v40 = vld [vmem:[#allocation12 + $0x70] sm:$0xf0]  ;;  %v2258_v41 = vld [vmem:[#allocation12 + $0x164] sm:$0xf]  ;;  %v1985_v44 = vor.u32 %v2260_v37, %v1984_v35  ;;  %v1840_v46 = vld [vmem:[#allocation12 + $0x40] sm:$0xf] }
  0x71   : > { %v1986_v42 = vld [vmem:[#allocation12 + $0x170] sm:$0xf0]  ;;  %v1861_v45 = vor.u32 %v2226_v38, %v1858_v40  ;;  %v2224_v47 = vld [vmem:[#allocation12 + $0x4c] sm:$0xf0]  ;;  %v1968_v48 = vld [vmem:[#allocation12 + $0x140] sm:$0xf] }
  0x72   : > { %1068 = vmatpush.bf16.msra.mxu2 %v1909_v7  ;;  %1081 = vmatpush.bf16.msra.mxu3 %v2037_v11  ;;  %v1989_v49 = vor.u32 %v2258_v41, %v1986_v42  ;;  %v2256_v50 = vld [vmem:[#allocation12 + $0x14c] sm:$0xf0]  ;;  %v2222_v51 = vld [vmem:[#allocation12 + $0x44] sm:$0xf]  ;;  %v1842_v52 = vld [vmem:[#allocation12 + $0x50] sm:$0xf0]  ;;  %v1841_v55 = vor.u32 %v2224_v47, %v1840_v46 }
  0x73   : > { %1802 = vmatmul.msk.bf16.vlgmr.msrb.gmra.mxu0 %vm513_vm0, %v2911_v39  ;;  %1803 = vmatmul.msk.bf16.vlgmr.msrb.gmra.mxu1 %vm513_vm0, %v2911_v39  ;;  %v2254_v53 = vld [vmem:[#allocation12 + $0x144] sm:$0xf]  ;;  %v1970_v54 = vld [vmem:[#allocation12 + $0x150] sm:$0xf0]  ;;  %v1969_v56 = vor.u32 %v2256_v50, %v1968_v48  ;;  %v1845_v57 = vor.u32 %v2222_v51, %v1842_v52  ;;  %v1824_v58 = vld [vmem:[#allocation12 + $0x20] sm:$0xf] }
  0x74   : > { %1043 = vmatpush.bf16.msra.mxu0 %v1889_v18  ;;  %1056 = vmatpush.bf16.msra.mxu1 %v2017_v19  ;;  %v2220_v59 = vld [vmem:[#allocation12 + $0x2c] sm:$0xf0]  ;;  %v1952_v60 = vld [vmem:[#allocation12 + $0x120] sm:$0xf]  ;;  %v1973_v61 = vor.u32 %v2254_v53, %v1970_v54  ;;  %v2218_v63 = vld [vmem:[#allocation12 + $0x24] sm:$0xf] }
  0x75   : > { %1804 = vmatmul.msk.bf16.vlgmr.msrb.gmra.mxu2 %vm513_vm0, %v2911_v39  ;;  %1805 = vmatmul.msk.bf16.vlgmr.msrb.gmra.mxu3 %vm513_vm0, %v2911_v39  ;;  %v2252_v62 = vld [vmem:[#allocation12 + $0x12c] sm:$0xf0]  ;;  %v1826_v0 = vld [vmem:[#allocation12 + $0x30] sm:$0xf0]  ;;  %v2250_v1 = vld [vmem:[#allocation12 + $0x124] sm:$0xf]  ;;  %v1825_v3 = vor.u32 %v2220_v59, %v1824_v58 }
  0x76   : > { %1069 = vmatpush.bf16.msra.mxu2 %v1893_v20  ;;  %1082 = vmatpush.bf16.msra.mxu3 %v2021_v24  ;;  %v1954_v2 = vld [vmem:[#allocation12 + $0x130] sm:$0xf0]  ;;  %v1953_v39 = vor.u32 %v2252_v62, %v1952_v60  ;;  %v1829_v4 = vor.u32 %v2218_v63, %v1826_v0  ;;  %v1808_v5 = vld [vmem:[#allocation12] sm:$0xf]  ;;  %v2216_v6 = vld [vmem:[#allocation12 + $0xc] sm:$0xf0] }
  0x77   : > { %v1936_v7 = vld [vmem:[#allocation12 + $0x100] sm:$0xf]  ;;  %v1957_v8 = vor.u32 %v2250_v1, %v1954_v2  ;;  %v2248_v9 = vld [vmem:[#allocation12 + $0x10c] sm:$0xf0]  ;;  %v2214_v10 = vld [vmem:[#allocation12 + $0x4] sm:$0xf]  ;;  %v1809_v14 = vor.u32 %v2216_v6, %v1808_v5 }
  0x78   : > { %1044 = vmatpush.bf16.msra.mxu0 %v1873_v30  ;;  %1057 = vmatpush.bf16.msra.mxu1 %v2001_v31  ;;  %v1810_v11 = vld [vmem:[#allocation12 + $0x10] sm:$0xf0]  ;;  %v2246_v12 = vld [vmem:[#allocation12 + $0x104] sm:$0xf]  ;;  %v1937_v16 = vor.u32 %v2248_v9, %v1936_v7  ;;  %v654_v18 = vld [vmem:[%s2895_s12 + $0x8] sm:$0xff]  ;;  %vm1179_vm3 = vcmask 1043456  }
  0x79   : > { %v1938_v13 = vld [vmem:[#allocation12 + $0x110] sm:$0xf0]  ;;  %v1813_v17 = vor.u32 %v2214_v10, %v1810_v11  ;;  %v2933_v21 = vpack.c.bf16 %v654_v18, %v654_v18  ;;  %v2243_v22 = vld [vmem:[#allocation12 + $0xec] sm:$0xf]  ;;  %v1930_v23 = vld [vmem:[#allocation12 + $0xf8] sm:$0xf0] }
  0x7a   : > { %1070 = vmatpush.bf16.msra.mxu2 %v1877_v32  ;;  %1083 = vmatpush.bf16.msra.mxu3 %v2005_v36  ;;  %v653_v15 = vld [vmem:[%s2895_s12] sm:$0xff]  ;;  %v1941_v19 = vor.u32 %v2246_v12, %v1938_v13  ;;  %v1933_v24 = vor.u32 %v2243_v22, %v1930_v23  ;;  %v1928_v25 = vld [vmem:[#allocation12 + $0xe8] sm:$0xf]  ;;  %v2245_v26 = vld [vmem:[#allocation12 + $0xf4] sm:$0xf0]  ;;  %vm1162_vm4 = vcmask 60416  }
  0x7b   : > { %v2931_v20 = vpack.c.bf16 %v653_v15, %v653_v15  ;;  %v2239_v27 = vld [vmem:[#allocation12 + $0xcc] sm:$0xf]  ;;  %v1929_v28 = vor.u32 %v2245_v26, %v1928_v25  ;;  %v1914_v29 = vld [vmem:[#allocation12 + $0xd8] sm:$0xf0]  ;;  %v1912_v31 = vld [vmem:[#allocation12 + $0xc8] sm:$0xf] }
  0x7c   : > { %1045 = vmatpush.bf16.msra.mxu0 %v1857_v43  ;;  %1058 = vmatpush.bf16.msra.mxu1 %v1985_v44  ;;  %v1917_v30 = vor.u32 %v2239_v27, %v1914_v29  ;;  %v2241_v32 = vld [vmem:[#allocation12 + $0xd4] sm:$0xf0]  ;;  %v2235_v33 = vld [vmem:[#allocation12 + $0xac] sm:$0xf]  ;;  %v1898_v35 = vld [vmem:[#allocation12 + $0xb8] sm:$0xf0] }
  0x7d   : > { %v1913_v34 = vor.u32 %v2241_v32, %v1912_v31  ;;  %v2275_v36 = vld [vmem:[#allocation12 + $0x1ec] sm:$0xf]  ;;  %v2058_v37 = vld [vmem:[#allocation12 + $0x1f8] sm:$0xf0]  ;;  %v1901_v38 = vor.u32 %v2235_v33, %v1898_v35  ;;  %v1896_v41 = vld [vmem:[#allocation12 + $0xa8] sm:$0xf] }
  0x7e   : > { %1071 = vmatpush.bf16.msra.mxu2 %v1861_v45  ;;  %1084 = vmatpush.bf16.msra.mxu3 %v1989_v49  ;;  %v2061_v40 = vor.u32 %v2275_v36, %v2058_v37  ;;  %v2237_v42 = vld [vmem:[#allocation12 + $0xb4] sm:$0xf0]  ;;  %v2231_v43 = vld [vmem:[#allocation12 + $0x8c] sm:$0xf]  ;;  %v1882_v45 = vld [vmem:[#allocation12 + $0x98] sm:$0xf0]  ;;  %v627_v37 = vlaneseq }
  0x7f   : > { %v1897_v44 = vor.u32 %v2237_v42, %v1896_v41  ;;  %v2271_v46 = vld [vmem:[#allocation12 + $0x1cc] sm:$0xf]  ;;  %v2042_v47 = vld [vmem:[#allocation12 + $0x1d8] sm:$0xf0]  ;;  %v1885_v48 = vor.u32 %v2231_v43, %v1882_v45  ;;  %v2056_v50 = vld [vmem:[#allocation12 + $0x1e8] sm:$0xf] }
  0x80   : > { %1046 = vmatpush.bf16.msra.mxu0 %v1841_v55  ;;  %1059 = vmatpush.bf16.msra.mxu1 %v1969_v56  ;;  %v2045_v49 = vor.u32 %v2271_v46, %v2042_v47  ;;  %v2277_v51 = vld [vmem:[#allocation12 + $0x1f4] sm:$0xf0]  ;;  %v1880_v53 = vld [vmem:[#allocation12 + $0x88] sm:$0xf]  ;;  %v2227_v55 = vld [vmem:[#allocation12 + $0x6c] sm:$0xf] }
  0x81   : > { %v2057_v52 = vor.u32 %v2277_v51, %v2056_v50  ;;  %v2233_v54 = vld [vmem:[#allocation12 + $0x94] sm:$0xf0]  ;;  %v2267_v58 = vld [vmem:[#allocation12 + $0x1ac] sm:$0xf]  ;;  %v2026_v60 = vld [vmem:[#allocation12 + $0x1b8] sm:$0xf0] }
  0x82   : > { %1072 = vmatpush.bf16.msra.mxu2 %v1845_v57  ;;  %1085 = vmatpush.bf16.msra.mxu3 %v1973_v61  ;;  %v1881_v56 = vor.u32 %v2233_v54, %v1880_v53  ;;  %v1866_v57 = vld [vmem:[#allocation12 + $0x78] sm:$0xf0]  ;;  %v2040_v61 = vld [vmem:[#allocation12 + $0x1c8] sm:$0xf]  ;;  %v2273_v62 = vld [vmem:[#allocation12 + $0x1d4] sm:$0xf0]  ;;  %v2029_v63 = vor.u32 %v2267_v58, %v2026_v60 }
  0x83   : > { %v1869_v59 = vor.u32 %v2227_v55, %v1866_v57  ;;  %v2041_v0 = vor.u32 %v2273_v62, %v2040_v61  ;;  %v1864_v1 = vld [vmem:[#allocation12 + $0x68] sm:$0xf]  ;;  %v2229_v2 = vld [vmem:[#allocation12 + $0x74] sm:$0xf0]  ;;  %v2263_v5 = vld [vmem:[#allocation12 + $0x18c] sm:$0xf] }
  0x84   : > { %1047 = vmatpush.bf16.msra.mxu0 %v1825_v3  ;;  %1060 = vmatpush.bf16.msra.mxu1 %v1953_v39  ;;  %v2223_v3 = vld [vmem:[#allocation12 + $0x4c] sm:$0xf]  ;;  %v1865_v39 = vor.u32 %v2229_v2, %v1864_v1  ;;  %v2010_v6 = vld [vmem:[#allocation12 + $0x198] sm:$0xf0]  ;;  %v2024_v9 = vld [vmem:[#allocation12 + $0x1a8] sm:$0xf] }
  0x85   : > { %v2269_v10 = vld [vmem:[#allocation12 + $0x1b4] sm:$0xf0]  ;;  %v1848_v13 = vld [vmem:[#allocation12 + $0x48] sm:$0xf]  ;;  %v2219_v15 = vld [vmem:[#allocation12 + $0x2c] sm:$0xf] }
  0x86   : > { %1073 = vmatpush.bf16.msra.mxu2 %v1829_v4  ;;  %1086 = vmatpush.bf16.msra.mxu3 %v1957_v8  ;;  %v1850_v4 = vld [vmem:[#allocation12 + $0x58] sm:$0xf0]  ;;  %v2013_v8 = vor.u32 %v2263_v5, %v2010_v6  ;;  %v2025_v12 = vor.u32 %v2269_v10, %v2024_v9  ;;  %v2259_v18 = vld [vmem:[#allocation12 + $0x16c] sm:$0xf]  ;;  %v2265_v25 = vld [vmem:[#allocation12 + $0x194] sm:$0xf0] }
  0x87   : > { %v1853_v7 = vor.u32 %v2223_v3, %v1850_v4  ;;  %v2939_v11 = vld [vmem:[#allocation9] sm:$0xff]  ;;  %v1832_v29 = vld [vmem:[#allocation12 + $0x28] sm:$0xf]  ;;  %v2215_v31 = vld [vmem:[#allocation12 + $0xc] sm:$0xf]  ;;  %vm2943_vm2 = vcmp.lt.s32.totalorder %v627_v37, 256 }
  0x88   : > { %1048 = vmatpush.bf16.msra.mxu0 %v1809_v14  ;;  %1061 = vmatpush.bf16.msra.mxu1 %v1937_v16  ;;  %v2225_v14 = vld [vmem:[#allocation12 + $0x54] sm:$0xf0]  ;;  %v497_v26 = vperm.slane %v2939_v11, 0  ;;  %v498_v27 = vperm.slane %v2939_v11, 1  ;;  %v1818_v33 = vld [vmem:[#allocation12 + $0x18] sm:$0xf0] }
  0x89   : > { %v1849_v16 = vor.u32 %v2225_v14, %v1848_v13  ;;  %v1978_v35 = vld [vmem:[#allocation12 + $0x158] sm:$0xf0]  ;;  %v1992_v41 = vld [vmem:[#allocation12 + $0x168] sm:$0xf]  ;;  %v2261_v42 = vld [vmem:[#allocation12 + $0x174] sm:$0xf0] }
  0x8a   : > { %1074 = vmatpush.bf16.msra.mxu2 %v1813_v17  ;;  %1087 = vmatpush.bf16.msra.mxu3 %v1941_v19  ;;  %v1834_v17 = vld [vmem:[#allocation12 + $0x38] sm:$0xf0]  ;;  %v1816_v47 = vld [vmem:[#allocation12 + $0x8] sm:$0xf]  ;;  %v499_v57 = vperm.slane %v2939_v11, 2  ;;  %v500_v58 = vperm.slane %v2939_v11, 3 }
  0x8b   : > { %1049 = vmatmul.bf16.vlgmr.msra.gmra.mxu0 %v2931_v20  ;;  %1062 = vmatmul.bf16.vlgmr.msra.gmra.mxu1 %v2933_v21  ;;  %v1994_v19 = vld [vmem:[#allocation12 + $0x178] sm:$0xf0]  ;;  %v1837_v22 = vor.u32 %v2219_v15, %v1834_v17  ;;  %v1976_v55 = vld [vmem:[#allocation12 + $0x148] sm:$0xf]  ;;  %v2247_v61 = vld [vmem:[#allocation12 + $0x10c] sm:$0xf] }
  0x8c   : > { %1093 = vmatpush.bf16.msrb.mxu0 %v1929_v28  ;;  %1106 = vmatpush.bf16.msrb.mxu1 %v2057_v52  ;;  %v1997_v23 = vor.u32 %v2259_v18, %v1994_v19  ;;  %v1962_v51 = vld [vmem:[#allocation12 + $0x138] sm:$0xf0]  ;;  %v1960_v3 = vld [vmem:[#allocation12 + $0x128] sm:$0xf]  ;;  %v2249_v10 = vld [vmem:[#allocation12 + $0x114] sm:$0xf0] }
  0x8d   : > { %1075 = vmatmul.bf16.vlgmr.msra.gmra.mxu2 %v2931_v20  ;;  %1088 = vmatmul.bf16.vlgmr.msra.gmra.mxu3 %v2933_v21  ;;  %v1946_v62 = vld [vmem:[#allocation12 + $0x118] sm:$0xf0]  ;;  %v1944_v9 = vld [vmem:[#allocation12 + $0x108] sm:$0xf]  ;;  %v501_v15 = vperm.slane %v2939_v11, 4  ;;  %vm1175_vm5 = vcmask 64512  }
  0x8e   : > { %1119 = vmatpush.bf16.msrb.mxu2 %v1933_v24  ;;  %1132 = vmatpush.bf16.msrb.mxu3 %v2061_v40  ;;  %v2008_v24 = vld [vmem:[#allocation12 + $0x188] sm:$0xf]  ;;  %v1945_v13 = vor.u32 %v2249_v10, %v1944_v9  ;;  %s1733_s28 = sshll.u32 %s2881_s22, 3  ;;  %s2310_s23 = sshll.u32 %s2763_s8, 3 }
  0x8f   : > { %v2009_v28 = vor.u32 %v2265_v25, %v2008_v24  ;;  %v503_v24 = vperm.slane %v2939_v11, 6  ;;  %v504_v25 = vperm.slane %v2939_v11, 7  ;;  %s1585_s2 = scalar_lea.hbm %s3040_s7, %s2310_s23  ;;  %s395_s11 = scalar_lea.vmem [#allocation15], %s1733_s28 }
  0x90   : > { %1094 = vmatpush.bf16.msrb.mxu0 %v1913_v34  ;;  %1107 = vmatpush.bf16.msrb.mxu1 %v2041_v0  ;;  %v2255_v34 = vld [vmem:[#allocation12 + $0x14c] sm:$0xf]  ;;  %v1949_v0 = vor.u32 %v2247_v61, %v1946_v62  ;;  %s1587_s14 = sshll.u32 %s395_s11, 4  ;;  %s1589_s16 = sshll.u32 %s1585_s2, 4  ;;  %s1588_s14 = int_to_ptr.vmem [resolvable:$true] %s1587_s14  ;;  %s1590_s16 = int_to_ptr.hbm [resolvable:$true] %s1589_s16 }
  0x91   : > { %v1981_v40 = vor.u32 %v2255_v34, %v1978_v35  ;;  %s1574_s8 = scalar_lea.sflag [#allocation6], %s2881_s22  ;;  %s2617_s21 = sshra.s32 %s1590_s16, 4  ;;  %s2618_s21 = int_to_ptr.hbm [resolvable:$true] %s2617_s21 }
  0x92   : > { %1120 = vmatpush.bf16.msrb.mxu2 %v1917_v30  ;;  %1133 = vmatpush.bf16.msrb.mxu3 %v2045_v49  ;;  %v2221_v30 = vld [vmem:[#allocation12 + $0x34] sm:$0xf0]  ;;  %v2251_v49 = vld [vmem:[#allocation12 + $0x12c] sm:$0xf]  ;;  %s2619_s4 = scalar_lea.hbm %s2618_s21, 8  ;;  %s2623_s20 = scalar_lea.hbm %s3040_s7, 16 }
  0x93   : > { %v1833_v32 = vor.u32 %v2221_v30, %v1832_v29  ;;  %v1965_v54 = vor.u32 %v2251_v49, %v1962_v51  ;;  %p2620_p1 = scmp.ne.s32.totalorder %s2618_s21, %s2619_s4  ;;  %p2624_p7 = scmp.lt.s32.totalorder %s2618_s21, %s3040_s7 }
  0x94   : > { %1095 = vmatpush.bf16.msrb.mxu0 %v1897_v44  ;;  %1108 = vmatpush.bf16.msrb.mxu1 %v2025_v12  ;;  %v1993_v44 = vor.u32 %v2261_v42, %v1992_v41  ;;  %p2625_p9 = scmp.lt.s32.totalorder %s2623_s20, %s2619_s4 }
  0x95   : > { %p2621_p3 = pnand %p2620_p1, %p2828_p4 }
  0x96   : > { %1121 = vmatpush.bf16.msrb.mxu2 %v1901_v38  ;;  %1134 = vmatpush.bf16.msrb.mxu3 %v2029_v63  ;;  %v1821_v38 = vor.u32 %v2215_v31, %v1818_v33  ;;  %p2626_p5 = por %p2625_p9, %p2624_p7 }
  0x97   : > { %p2622_p12 = pneg %p2621_p3 }
  0x98   : > { %1096 = vmatpush.bf16.msrb.mxu0 %v1881_v56  ;;  %1109 = vmatpush.bf16.msrb.mxu1 %v2009_v28  ;;  %v2257_v56 = vld [vmem:[#allocation12 + $0x154] sm:$0xf0] }
  0x99   : > { %p2627_p8 = pnand %p2626_p5, %p2622_p12 }
  0x9a   : > { %1122 = vmatpush.bf16.msrb.mxu2 %v1885_v48  ;;  %1135 = vmatpush.bf16.msrb.mxu3 %v2013_v8  ;;  %v2217_v48 = vld [vmem:[#allocation12 + $0x14] sm:$0xf0] }
  0x9b   : > { %v1817_v50 = vor.u32 %v2217_v48, %v1816_v47 }
  0x9c   : > { %1097 = vmatpush.bf16.msrb.mxu0 %v1865_v39  ;;  %1110 = vmatpush.bf16.msrb.mxu1 %v1993_v44  ;;  %v2253_v39 = vld [vmem:[#allocation12 + $0x134] sm:$0xf0] }
  0x9e   : > { %1123 = vmatpush.bf16.msrb.mxu2 %v1869_v59  ;;  %1136 = vmatpush.bf16.msrb.mxu3 %v1997_v23  ;;  %v1977_v59 = vor.u32 %v2257_v56, %v1976_v55 }
  0xa0   : > { %1098 = vmatpush.bf16.msrb.mxu0 %v1849_v16  ;;  %1111 = vmatpush.bf16.msrb.mxu1 %v1977_v59  ;;  %v502_v16 = vperm.slane %v2939_v11, 5 }
  0xa2   : > { %1124 = vmatpush.bf16.msrb.mxu2 %v1853_v7  ;;  %1137 = vmatpush.bf16.msrb.mxu3 %v1981_v40  ;;  %v1961_v7 = vor.u32 %v2253_v39, %v1960_v3 }
  0xa4   : > { %1099 = vmatpush.bf16.msrb.mxu0 %v1833_v32  ;;  %1112 = vmatpush.bf16.msrb.mxu1 %v1961_v7 }
  0xa6   : > { %1125 = vmatpush.bf16.msrb.mxu2 %v1837_v22  ;;  %1138 = vmatpush.bf16.msrb.mxu3 %v1965_v54 }
  0xa8   : > { %1100 = vmatpush.bf16.msrb.mxu0 %v1817_v50  ;;  %1113 = vmatpush.bf16.msrb.mxu1 %v1945_v13 }
  0xaa   : > { %1126 = vmatpush.bf16.msrb.mxu2 %v1821_v38  ;;  %1139 = vmatpush.bf16.msrb.mxu3 %v1949_v0 }
  0xab   : > { %1101 = vmatmul.bf16.vlgmr.msrb.gmra.mxu0 %v2931_v20  ;;  %1114 = vmatmul.bf16.vlgmr.msrb.gmra.mxu1 %v2933_v21 }
  0xad   : > { %1127 = vmatmul.bf16.vlgmr.msrb.gmra.mxu2 %v2931_v20  ;;  %1140 = vmatmul.bf16.vlgmr.msrb.gmra.mxu3 %v2933_v21 }
  0xe0   : > { %v526_v36 = vpop.f32.mrf.mxu0  ;;  %v539_v43 = vpop.f32.mrf.mxu1 }
  0xe1   : > { %v527_v45 = vadd.f32 %v526_v36, %v497_v26  ;;  %v540_v46 = vadd.f32 %v539_v43, %v498_v27 }
  0xe3   : > { %v623_v52 = vrot.slane %v540_v46, 7 }
  0xe5   : > { %v625_v60 = vsel %vm624_vm1, %v527_v45, %v623_v52 }
  0xe6   : > { %631 = vst.msk [vmem:[#allocation2] ss:$4 sm:$0x3] %vm2943_vm2, %v625_v60 }
  0xe8   : > { %v552_v63 = vpop.f32.mrf.mxu2  ;;  %v565_v1 = vpop.f32.mrf.mxu3 }
  0xe9   : > { %v528_v2 = vpop.f32.mrf.mxu0  ;;  %v553_v4 = vadd.f32 %v552_v63, %v499_v57  ;;  %v566_v5 = vadd.f32 %v565_v1, %v500_v58  ;;  %v541_v6 = vpop.f32.mrf.mxu1 }
  0xeb   : > { %v634_v8 = vrot.slane %v566_v5, 7 }
  0xed   : > { %v635_v12 = vsel %vm624_vm1, %v553_v4, %v634_v8 }
  0xee   : > { %638 = vst.msk [vmem:[#allocation2 + $0x1] ss:$4 sm:$0x3] %vm2943_vm2, %v635_v12 }
  0xf0   : > { %v554_v20 = vpop.f32.mrf.mxu2  ;;  %v567_v14 = vpop.f32.mrf.mxu3 }
  0xf1   : > { %v578_v17 = vpop.f32.mrf.mxu0  ;;  %v591_v18 = vpop.f32.mrf.mxu1 }
  0xf2   : > { %v579_v19 = vadd.f32 %v578_v17, %v501_v15  ;;  %v592_v22 = vadd.f32 %v591_v18, %v502_v16 }
  0xf4   : > { %v641_v23 = vrot.slane %v592_v22, 7 }
  0xf6   : > { %v642_v26 = vsel %vm624_vm1, %v579_v19, %v641_v23 }
  0xf7   : > { %645 = vst.msk [vmem:[#allocation2 + $0x2] ss:$4 sm:$0x3] %vm2943_vm2, %v642_v26 }
  0xf8   : > { %v604_v27 = vpop.f32.mrf.mxu2  ;;  %v617_v28 = vpop.f32.mrf.mxu3 }
  0xf9   : > { %v580_v29 = vpop.f32.mrf.mxu0  ;;  %v605_v30 = vadd.f32 %v604_v27, %v503_v24  ;;  %v618_v31 = vadd.f32 %v617_v28, %v504_v25  ;;  %v593_v32 = vpop.f32.mrf.mxu1 }
  0xfb   : > { %v648_v21 = vrot.slane %v618_v31, 7 }
  0xfd   : > { %v649_v33 = vsel %vm624_vm1, %v605_v30, %v648_v21 }
  0xfe   : > { %652 = vst.msk [vmem:[#allocation2 + $0x3] ss:$4 sm:$0x3] %vm2943_vm2, %v649_v33 }
 0x100   : > { %v606_v34 = vpop.f32.mrf.mxu2  ;;  %v619_v35 = vpop.f32.mrf.mxu3 }
 0x105   : > { %v1147_v48 = vld [vmem:[#allocation2] sm:$0xf]  ;;  %v1197_v51 = vld [vmem:[#allocation2 + $0x4] sm:$0xf] }
 0x106   : > { %v1148_v50 = vpack.c.bf16 %v1147_v48, %v1147_v48  ;;  %v1198_v52 = vpack.c.bf16 %v1197_v51, %v1197_v51 }
 0x108   : > { %v1050_v11 = vpop.f32.mrf.mxu0  ;;  %v1063_v36 = vpop.f32.mrf.mxu1 }
 0x109   : > { %v1064_v37 = vadd.f32 %v1063_v36, %v1050_v11 }
 0x110   : > { %v1076_v38 = vpop.f32.mrf.mxu2  ;;  %v1089_v40 = vpop.f32.mrf.mxu3 }
 0x111   : > { %v1052_v41 = vpop.f32.mrf.mxu0  ;;  %v1090_v42 = vadd.f32 %v1089_v40, %v1076_v38  ;;  %v1065_v43 = vpop.f32.mrf.mxu1 }
 0x113   : > { %v1145_v44 = vpack.c.bf16 %v1090_v42, %v1064_v37  ;;  %v2697_v37 = vmov 256.0  }
 0x115   : > { %v1200_v45 = vunpack.c.h.b16 %v1145_v44  ;;  %1156 = vmatpush.bf16.xpose.msra.mxu0 %v1145_v44  ;;  %v2698_v44 = vmov 839922192  }
 0x117   : > { %v1201_v46 = vpack.c.b16 %v1200_v45, %v1200_v45  ;;  %v2977_v45 = vunpack.c.l.s4 %v2698_v44  ;;  %v2154_v44 = vld [vmem:[#allocation13 + $0xb0] sm:$0xf] }
 0x118   : > { %v1078_v47 = vpop.f32.mrf.mxu2  ;;  %v1091_v49 = vpop.f32.mrf.mxu3 }
 0x119   : > { %1210 = vmatpush.bf16.xpose.msra.mxu2 %v1201_v46  ;;  %v1274_v47 = vunpack.c.0.s8 %v2977_v45  ;;  %v1349_v45 = vld [vmem:[%s3039_s6] sm:$0x3] }
 0x11c   : > { %1157 = vmatmul.bf16.vlgmr.msra.gmra.mxu0 %v1148_v50 }
 0x120   : > { %1211 = vmatmul.bf16.vlgmr.msra.gmra.mxu2 %v1198_v52 }
 0x128   : > { %v1102_v53 = vpop.f32.mrf.mxu0  ;;  %v1115_v56 = vpop.f32.mrf.mxu1 }
 0x129   : > { %v1116_v58 = vadd.f32 %v1115_v56, %v1102_v53 }
 0x130   : > { %v1128_v54 = vpop.f32.mrf.mxu2  ;;  %v1104_v55 = vpop.f32.mrf.mxu0 }
 0x131   : > { %v1141_v59 = vpop.f32.mrf.mxu3  ;;  %v1117_v0 = vpop.f32.mrf.mxu1 }
 0x132   : > { %v1142_v60 = vadd.f32 %v1141_v59, %v1128_v54  ;;  %v2293_v59 = vld [vmem:[#allocation13 + $0x74] sm:$0xf0]  ;;  %v2124_v0 = vld [vmem:[#allocation13 + $0x78] sm:$0xf0] }
 0x134   : > { %v1146_v61 = vpack.c.bf16 %v1142_v60, %v1116_v58  ;;  %v2122_v58 = vld [vmem:[#allocation13 + $0x70] sm:$0xf] }
 0x135   : > { %v2186_v60 = vld [vmem:[#allocation13 + $0xf0] sm:$0xf] }
 0x136   : > { %v1229_v62 = vunpack.c.h.b16 %v1146_v61  ;;  %v1181_v63 = vsel %vm1179_vm3, %v1146_v61, 0  ;;  %v2123_v61 = vor.u32 %v2293_v59, %v2122_v58  ;;  %v2082_v58 = vld [vmem:[#allocation13 + $0x20] sm:$0xf]  ;;  %v2283_v59 = vld [vmem:[#allocation13 + $0x24] sm:$0xf0] }
 0x137   : > { %1190 = vmatpush.bf16.msra.mxu1 %v1181_v63  ;;  %v2292_v63 = vld [vmem:[#allocation13 + $0x74] sm:$0xf] }
 0x138   : > { %v1130_v57 = vpop.f32.mrf.mxu2  ;;  %v1230_v1 = vpack.c.b16 %v1229_v62, %v1229_v62  ;;  %v2309_v62 = vld [vmem:[#allocation13 + $0xf4] sm:$0xf0]  ;;  %1515 = vmatpush.bf16.msrb.mxu0 %v2123_v61  ;;  %v2083_v61 = vor.u32 %v2283_v59, %v2082_v58 }
 0x139   : > { %v1143_v2 = vpop.f32.mrf.mxu3 }
 0x13a   : > { %v1235_v3 = vsel %vm1179_vm3, %v1230_v1, 0  ;;  %v2187_v1 = vor.u32 %v2309_v62, %v2186_v60  ;;  %v2127_v2 = vor.u32 %v2292_v63, %v2124_v0  ;;  %v2146_v60 = vld [vmem:[#allocation13 + $0xa0] sm:$0xf]  ;;  %v2299_v62 = vld [vmem:[#allocation13 + $0xa4] sm:$0xf0] }
 0x13b   : > { %1244 = vmatpush.bf16.msra.mxu3 %v1235_v3  ;;  %v2308_v3 = vld [vmem:[#allocation13 + $0xf4] sm:$0xf]  ;;  %v2282_v63 = vld [vmem:[#allocation13 + $0x24] sm:$0xf]  ;;  %v2084_v0 = vld [vmem:[#allocation13 + $0x28] sm:$0xf0] }
 0x13c   : > { %1528 = vmatpush.bf16.msrb.mxu1 %v2187_v1  ;;  %1541 = vmatpush.bf16.msrb.mxu2 %v2127_v2  ;;  %v2147_v1 = vor.u32 %v2299_v62, %v2146_v60  ;;  %v2087_v2 = vor.u32 %v2282_v63, %v2084_v0 }
 0x199   : > { %v1158_v39 = vpop.f32.mrf.mxu0 }
 0x19a   : > { %v1163_v8 = vsel %vm1162_vm4, %v1158_v39, -inf }
 0x1a1   : > { %v1160_v4 = vpop.f32.mrf.mxu0 }
 0x1a3   : > { %v1212_v5 = vpop.f32.mrf.mxu2 }
 0x1a4   : > { %v1216_v6 = vsel %vm1162_vm4, %v1212_v5, -inf }
 0x1a5   : > { %1217 = vmax.xlane.f32.xlu0 %v1216_v6  ;;  %v2291_v6 = vld [vmem:[#allocation13 + $0x64] sm:$0xf0] }
 0x1ab   : > { %v1214_v7 = vpop.f32.mrf.mxu2 }
 0x1ac   : > { %v2178_v7 = vld [vmem:[#allocation13 + $0xe0] sm:$0xf] }
 0x1ad   : > { %1164 = vmax.xlane.f32.xlu0 %v1163_v8 }
 0x218   : > { %v1218_v9 = vpop.xlane.xlu0 %1217 }
 0x219   : > { %v1219_v10 = vsub.f32 %v1212_v5, %v1218_v9  ;;  %v2114_v5 = vld [vmem:[#allocation13 + $0x60] sm:$0xf]  ;;  %v2307_v9 = vld [vmem:[#allocation13 + $0xe4] sm:$0xf0] }
 0x21a   : > { %v2115_v8 = vor.u32 %v2291_v6, %v2114_v5  ;;  %v2074_v5 = vld [vmem:[#allocation13 + $0x10] sm:$0xf]  ;;  %v2281_v6 = vld [vmem:[#allocation13 + $0x14] sm:$0xf0] }
 0x21b   : > { %v1220_v12 = vmul.f32 1.442695, %v1219_v10  ;;  %v2290_v10 = vld [vmem:[#allocation13 + $0x64] sm:$0xf] }
 0x21c   : > { %1516 = vmatpush.bf16.msrb.mxu0 %v2115_v8  ;;  %v2075_v8 = vor.u32 %v2281_v6, %v2074_v5 }
 0x21d   : > { %2411 = vpow2.f32 %v1220_v12  ;;  %v2116_v12 = vld [vmem:[#allocation13 + $0x68] sm:$0xf0] }
 0x220   : > { %v1165_v13 = vpop.xlane.xlu0 %1164 }
 0x221   : > { %v1166_v20 = vsub.f32 %v1158_v39, %v1165_v13  ;;  %v2188_v39 = vld [vmem:[#allocation13 + $0xf8] sm:$0xf0]  ;;  %v2179_v13 = vor.u32 %v2307_v9, %v2178_v7  ;;  %v2138_v7 = vld [vmem:[#allocation13 + $0x90] sm:$0xf]  ;;  %v2297_v9 = vld [vmem:[#allocation13 + $0x94] sm:$0xf0] }
 0x222   : > { %v2191_v4 = vor.u32 %v2308_v3, %v2188_v39  ;;  %v2298_v3 = vld [vmem:[#allocation13 + $0xa4] sm:$0xf]  ;;  %v2148_v39 = vld [vmem:[#allocation13 + $0xa8] sm:$0xf0] }
 0x223   : > { %v2412_v14 = vpop.eup %2411  ;;  %v1167_v15 = vmul.f32 1.442695, %v1166_v20  ;;  %v2119_v20 = vor.u32 %v2290_v10, %v2116_v12  ;;  %1529 = vmatpush.bf16.msrb.mxu1 %v2179_v13  ;;  %v2280_v10 = vld [vmem:[#allocation13 + $0x14] sm:$0xf]  ;;  %v2076_v12 = vld [vmem:[#allocation13 + $0x18] sm:$0xf0]  ;;  %v2139_v13 = vor.u32 %v2297_v9, %v2138_v7 }
 0x224   : > { %v1222_v16 = vsel %vm1162_vm4, %v2412_v14, 0.0  ;;  %1554 = vmatpush.bf16.msrb.mxu3 %v2191_v4  ;;  %v2151_v4 = vor.u32 %v2298_v3, %v2148_v39 }
 0x225   : > { %2413 = vpow2.f32 %v1167_v15  ;;  %1223 = vadd.xlane.f32.xlu1 %v1222_v16  ;;  %v2180_v15 = vld [vmem:[#allocation13 + $0xe8] sm:$0xf0]  ;;  %1542 = vmatpush.bf16.msrb.mxu2 %v2119_v20  ;;  %v2079_v20 = vor.u32 %v2280_v10, %v2076_v12 }
 0x22b   : > { %v2414_v17 = vpop.eup %2413 }
 0x22c   : > { %v1169_v18 = vsel %vm1162_vm4, %v2414_v17, 0.0 }
 0x22d   : > { %1170 = vadd.xlane.f32.xlu1 %v1169_v18  ;;  %v2289_v18 = vld [vmem:[#allocation13 + $0x54] sm:$0xf0] }
 0x298   : > { %v1224_v19 = vpop.xlane.xlu1 %1223 }
 0x299   : > { %2415 = vrcp.f32 %v1224_v19  ;;  %v2170_v19 = vld [vmem:[#allocation13 + $0xd0] sm:$0xf] }
 0x29f   : > { %v2416_v22 = vpop.eup %2415 }
 0x2a0   : > { %v1226_v23 = vmul.f32 %v2416_v22, %v2412_v14  ;;  %v1171_v24 = vpop.xlane.xlu1 %1170  ;;  %v2306_v14 = vld [vmem:[#allocation13 + $0xe4] sm:$0xf] }
 0x2a1   : > { %2417 = vrcp.f32 %v1171_v24  ;;  %v2183_v16 = vor.u32 %v2306_v14, %v2180_v15  ;;  %v2288_v24 = vld [vmem:[#allocation13 + $0x54] sm:$0xf]  ;;  %v2140_v15 = vld [vmem:[#allocation13 + $0x98] sm:$0xf0] }
 0x2a2   : > { %v1227_v25 = vpack.c.bf16 %v1226_v23, %v1226_v23  ;;  %2419 = vrcp.f32 %v2697_v37  ;;  %v2305_v23 = vld [vmem:[#allocation13 + $0xd4] sm:$0xf0]  ;;  %v2296_v14 = vld [vmem:[#allocation13 + $0x94] sm:$0xf] }
 0x2a3   : > { %1555 = vmatpush.bf16.msrb.mxu3 %v2183_v16  ;;  %v2066_v16 = vld [vmem:[#allocation13] sm:$0xf] }
 0x2a4   : > { %2063 = vmatmul.msk.bf16.vlgmr.msra.gmra.mxu3 %vm1175_vm5, %v1227_v25  ;;  %v2108_v25 = vld [vmem:[#allocation13 + $0x58] sm:$0xf0] }
 0x2a7   : > { %v2418_v26 = vpop.eup %2417 }
 0x2a8   : > { %v1173_v27 = vmul.f32 %v2418_v26, %v2414_v17  ;;  %v2420_v38 = vpop.eup %2419  ;;  %v2106_v17 = vld [vmem:[#allocation13 + $0x50] sm:$0xf]  ;;  %v2171_v26 = vor.u32 %v2305_v23, %v2170_v19  ;;  %v2130_v19 = vld [vmem:[#allocation13 + $0x80] sm:$0xf] }
 0x2a9   : > { %v1264_v40 = vmul.f32 256.0, %v2420_v38  ;;  %vm1268_vm6 = vweird.f32 %v2420_v38  ;;  %v2107_v22 = vor.u32 %v2289_v18, %v2106_v17  ;;  %v2143_v17 = vor.u32 %v2296_v14, %v2140_v15  ;;  %v2279_v18 = vld [vmem:[#allocation13 + $0x4] sm:$0xf0] }
 0x2aa   : > { %v1174_v28 = vpack.c.bf16 %v1173_v27, %v1173_v27  ;;  %v2111_v27 = vor.u32 %v2288_v24, %v2108_v25  ;;  %1530 = vmatpush.bf16.msrb.mxu1 %v2171_v26  ;;  %v2067_v23 = vor.u32 %v2279_v18, %v2066_v16  ;;  %v2278_v24 = vld [vmem:[#allocation13 + $0x4] sm:$0xf]  ;;  %v2068_v25 = vld [vmem:[#allocation13 + $0x8] sm:$0xf0] }
 0x2ab   : > { %v1265_v41 = vsub.f32 1.0, %v1264_v40  ;;  %1517 = vmatpush.bf16.msrb.mxu0 %v2107_v22  ;;  %v2164_v40 = vld [vmem:[#allocation13 + $0xc8] sm:$0xf0]  ;;  %v2295_v22 = vld [vmem:[#allocation13 + $0x84] sm:$0xf0] }
 0x2ac   : > { %2062 = vmatmul.msk.bf16.vlgmr.msra.gmra.mxu1 %vm1175_vm5, %v1174_v28  ;;  %v2304_v28 = vld [vmem:[#allocation13 + $0xd4] sm:$0xf]  ;;  %1543 = vmatpush.bf16.msrb.mxu2 %v2111_v27  ;;  %v2294_v26 = vld [vmem:[#allocation13 + $0x84] sm:$0xf] }
 0x2ad   : > { %v1266_v42 = vmul.f32 %v2420_v38, %v1265_v41 }
 0x2af   : > { %v1267_v43 = vadd.f32 %v2420_v38, %v1266_v42  ;;  %v2090_v42 = vld [vmem:[#allocation13 + $0x30] sm:$0xf] }
 0x2b1   : > { %v2979_v46 = vsel %vm1268_vm6, %v2420_v38, %v1267_v43  ;;  %v2302_v38 = vld [vmem:[#allocation13 + $0xc4] sm:$0xf]  ;;  %v2285_v43 = vld [vmem:[#allocation13 + $0x34] sm:$0xf0] }
 0x2b2   : > { %v2167_v41 = vor.u32 %v2302_v38, %v2164_v40 }
 0x327   : > { %v1246_v29 = vpop.f32.mrf.mxu3 }
 0x328   : > { %1250 = vst [vmem:[#allocation3 + $0x4] sm:$0xf] %v1246_v29  ;;  %v2172_v29 = vld [vmem:[#allocation13 + $0xd8] sm:$0xf0] }
 0x329   : > { %v1192_v30 = vpop.f32.mrf.mxu1 }
 0x32a   : > { %1196 = vst [vmem:[#allocation3] sm:$0xf] %v1192_v30  ;;  %v2175_v30 = vor.u32 %v2304_v28, %v2172_v29  ;;  %v2131_v28 = vor.u32 %v2295_v22, %v2130_v19  ;;  %v2071_v29 = vor.u32 %v2278_v24, %v2068_v25 }
 0x32c   : > { %1556 = vmatpush.bf16.msrb.mxu3 %v2175_v30  ;;  %v2132_v30 = vld [vmem:[#allocation13 + $0x88] sm:$0xf0] }
 0x32f   : > { %v1248_v31 = vpop.f32.mrf.mxu3 }
 0x330   : > { %v2098_v31 = vld [vmem:[#allocation13 + $0x40] sm:$0xf]  ;;  %1557 = vmatpush.bf16.msrb.mxu3 %v2167_v41 }
 0x331   : > { %v1251_v32 = vld [vmem:[#allocation3] sm:$0xff]  ;;  %v1194_v21 = vpop.f32.mrf.mxu1 }
 0x332   : > { %1253 = vst [vmem:[#allocation1] ss:$2 sm:$0xff] %v1251_v32  ;;  %v2162_v21 = vld [vmem:[#allocation13 + $0xc0] sm:$0xf] }
 0x339   : > { %v1254_v33 = vld.sshfl [vmem:[#allocation1] sm:$0xff pattern:$0x75316420]  ;;  %v1255_v34 = vld.sshfl [vmem:[#allocation1 + $0x8] sm:$0xff pattern:$0x75316420] }
 0x33a   : > { %v1258_v35 = vsel %vm1179_vm3, %v1254_v33, 0.0  ;;  %v1259_v11 = vsel %vm1179_vm3, %v1255_v34, 0.0  ;;  %v2303_v34 = vld [vmem:[#allocation13 + $0xc4] sm:$0xf0] }
 0x33b   : > { %v1260_v36 = vadd.f32 %v1259_v11, %v1258_v35  ;;  %v2286_v35 = vld [vmem:[#allocation13 + $0x44] sm:$0xf]  ;;  %v2100_v11 = vld [vmem:[#allocation13 + $0x48] sm:$0xf0] }
 0x33c   : > { %v2103_v37 = vor.u32 %v2286_v35, %v2100_v11 }
 0x33d   : > { %1261 = vadd.xlane.f32.xlu2 %v1260_v36  ;;  %v2163_v36 = vor.u32 %v2303_v34, %v2162_v21 }
 0x33e   : > { %1544 = vmatpush.bf16.msrb.mxu2 %v2103_v37 }
 0x33f   : > { %1531 = vmatpush.bf16.msrb.mxu1 %v2163_v36 }
 0x3b0   : > { %v1262_v48 = vpop.xlane.xlu2 %1261 }
 0x3b1   : > { %v1270_v49 = vmul.f32 %v2979_v46, %v1262_v48  ;;  %v2091_v48 = vor.u32 %v2285_v43, %v2090_v42 }
 0x3b3   : > { %v1275_v50 = vperm.slane %v1270_v49, %v1274_v47  ;;  %v2301_v49 = vld [vmem:[#allocation13 + $0xb4] sm:$0xf0] }
 0x3b5   : > { %v2985_v51 = vsub.f32 %v1251_v32, %v1275_v50  ;;  %v2287_v32 = vld [vmem:[#allocation13 + $0x44] sm:$0xf0]  ;;  %v2284_v50 = vld [vmem:[#allocation13 + $0x34] sm:$0xf] }
 0x3b6   : > { %v2099_v33 = vor.u32 %v2287_v32, %v2098_v31  ;;  %v2135_v32 = vor.u32 %v2294_v26, %v2132_v30 }
 0x3b7   : > { %v1278_v52 = vmul.f32 %v2985_v51, %v2985_v51 }
 0x3b8   : > { %1518 = vmatpush.bf16.msrb.mxu0 %v2099_v33 }
 0x3b9   : > { %1280 = vst [vmem:[#allocation1] ss:$2 sm:$0xff] %v1278_v52  ;;  %v2092_v52 = vld [vmem:[#allocation13 + $0x38] sm:$0xf0] }
 0x3bc   : > { %1519 = vmatpush.bf16.msrb.mxu0 %v2091_v48 }
 0x3c0   : > { %v1281_v53 = vld.sshfl [vmem:[#allocation1] sm:$0xff pattern:$0x75316420]  ;;  %v1282_v54 = vld.sshfl [vmem:[#allocation1 + $0x8] sm:$0xff pattern:$0x75316420]  ;;  %1520 = vmatpush.bf16.msrb.mxu0 %v2083_v61 }
 0x3c1   : > { %v1285_v55 = vsel %vm1179_vm3, %v1281_v53, 0.0  ;;  %v1286_v56 = vsel %vm1179_vm3, %v1282_v54, 0.0  ;;  %v2155_v53 = vor.u32 %v2301_v49, %v2154_v44  ;;  %v2095_v54 = vor.u32 %v2284_v50, %v2092_v52 }
 0x3c2   : > { %v1287_v57 = vadd.f32 %v1286_v56, %v1285_v55  ;;  %v2300_v55 = vld [vmem:[#allocation13 + $0xb4] sm:$0xf]  ;;  %v2156_v56 = vld [vmem:[#allocation13 + $0xb8] sm:$0xf0]  ;;  %v1352_v50 = vperm.slane %v1349_v45, 1 }
 0x3c3   : > { %1532 = vmatpush.bf16.msrb.mxu1 %v2155_v53  ;;  %1545 = vmatpush.bf16.msrb.mxu2 %v2095_v54 }
 0x3c4   : > { %1288 = vadd.xlane.f32.xlu2 %v1287_v57  ;;  %v2159_v57 = vor.u32 %v2300_v55, %v2156_v56  ;;  %1521 = vmatpush.bf16.msrb.mxu0 %v2075_v8 }
 0x3c6   : > { %1558 = vmatpush.bf16.msrb.mxu3 %v2159_v57 }
 0x3c7   : > { %1533 = vmatpush.bf16.msrb.mxu1 %v2147_v1  ;;  %1546 = vmatpush.bf16.msrb.mxu2 %v2087_v2 }
 0x3c8   : > { %1522 = vmatpush.bf16.msrb.mxu0 %v2067_v23 }
 0x3ca   : > { %1559 = vmatpush.bf16.msrb.mxu3 %v2151_v4 }
 0x3cb   : > { %1534 = vmatpush.bf16.msrb.mxu1 %v2139_v13  ;;  %1547 = vmatpush.bf16.msrb.mxu2 %v2079_v20 }
 0x3ce   : > { %1560 = vmatpush.bf16.msrb.mxu3 %v2143_v17 }
 0x3cf   : > { %1535 = vmatpush.bf16.msrb.mxu1 %v2131_v28  ;;  %1548 = vmatpush.bf16.msrb.mxu2 %v2071_v29 }
 0x3d2   : > { %1561 = vmatpush.bf16.msrb.mxu3 %v2135_v32 }
 0x437   : > { %v1289_v27 = vpop.xlane.xlu2 %1288 }
 0x438   : > { %v1290_v31 = vmul.f32 %v1289_v27, %v2979_v46 }
 0x43a   : > { %v1291_v21 = vadd.f32 1e-05, %v1290_v31 }
 0x43c   : > { %2421 = vrsqrt.f32 %v1291_v21  ;;  %vm1298_vm8 = vweird.f32 %v1291_v21 }
 0x442   : > { %v2422_v33 = vpop.eup %2421 }
 0x443   : > { %v1293_v34 = vmul.f32 %v2422_v33, %v1291_v21  ;;  %vm1299_vm7 = vweird.f32 %v2422_v33 }
 0x444   : > { %vm1300_vm9 = vmor %vm1298_vm8, %vm1299_vm7 }
 0x445   : > { %v1294_v35 = vmul.f32 %v2422_v33, %v1293_v34 }
 0x447   : > { %v1295_v11 = vmul.f32 0.5, %v1294_v35 }
 0x449   : > { %v1296_v36 = vsub.f32 1.5, %v1295_v11 }
 0x44b   : > { %v1297_v37 = vmul.f32 %v2422_v33, %v1296_v36 }
 0x44d   : > { %v1301_v38 = vsel %vm1300_vm9, %v2422_v33, %v1297_v37 }
 0x44e   : > { %v1306_v46 = vperm.slane %v1301_v38, %v1274_v47  ;;  %v1351_v47 = vperm.slane %v1349_v45, 0 }
 0x450   : > { %v1308_v40 = vmul.f32 %v1306_v46, %v2985_v51 }
 0x452   : > { %1310 = vst [vmem:[#allocation1] ss:$2 sm:$0xff] %v1308_v40 }
 0x459   : > { %v1311_v41 = vld.sshfl [vmem:[#allocation1] sm:$0xff pattern:$0x75316420]  ;;  %v1312_v42 = vld.sshfl [vmem:[#allocation1 + $0x8] sm:$0xff pattern:$0x75316420] }
 0x45a   : > { %v1315_v43 = vpack.c.bf16 %v1311_v41, %v1311_v41  ;;  %v1316_v44 = vpack.c.bf16 %v1312_v42, %v1312_v42 }
 0x45c   : > { %1523 = vmatmul.bf16.vlgmr.msrb.gmra.mxu0 %v1315_v43  ;;  %1536 = vmatmul.bf16.vlgmr.msrb.gmra.mxu1 %v1316_v44 }
 0x45d   : > { %1549 = vmatmul.bf16.vlgmr.msrb.gmra.mxu2 %v1315_v43  ;;  %1562 = vmatmul.bf16.vlgmr.msrb.gmra.mxu3 %v1316_v44 }
 0x4d9   : > { %v1524_v48 = vpop.f32.mrf.mxu0  ;;  %v1537_v49 = vpop.f32.mrf.mxu1 }
 0x4da   : > { %v1525_v53 = vadd.f32 %v1524_v48, %v1351_v47 }
 0x4dc   : > { %v1538_v58 = vadd.f32 %v1537_v49, %v1525_v53 }
 0x4e0   : > { %v1550_v51 = vpop.f32.mrf.mxu2  ;;  %v1563_v52 = vpop.f32.mrf.mxu3 }
 0x4e1   : > { %v1551_v54 = vadd.f32 %v1550_v51, %v1352_v50  ;;  %v1526_v55 = vpop.f32.mrf.mxu0  ;;  %v1539_v56 = vpop.f32.mrf.mxu1 }
 0x4e3   : > { %v1564_v57 = vadd.f32 %v1563_v52, %v1551_v54 }
 0x4e5   : > { %v1569_v59 = vrot.slane %v1564_v57, 4 }
 0x4e7   : > { %v1570_v60 = vsel %vm1179_vm3, %v1538_v58, %v1569_v59 }
 0x4e8   : > { %v1552_v61 = vpop.f32.mrf.mxu2  ;;  %v1565_v62 = vpop.f32.mrf.mxu3  ;;  %1572 = vst [vmem:[%s395_s11] sm:$0xff] %v1570_v60 }
 0x4e9   : > { %2630 = shalt.err (!%p2627_p8)
}
 0x4ea   : > { %2331 = dma.vmem_to_hbm [thread:$0]  (%p2828_p4), %s1588_s14, 128, %s1590_s16, %s1574_s8  }
 0x4eb PF: > { %s1601_s22 = sand.u32 1, %s2673_s24   ;;  %p3061_p10 = scmp.ge.s32.totalorder %s2685_s27, 2 }
 0x4ec   : > { %s1602_s17 = scalar_lea.sflag [#allocation6], %s1601_s22 }
 0x4ed   : > { %p2354_p13 = pnand %p3061_p10, %p2832_p6 }
 0x4ef   : > { %p2355_p11 = pneg %p2354_p13 }
 0x4f1   : > { %2668 = dma.done.wait (%p2355_p11), %s1602_s17, 128  }
 0x4f2   : > { %2670 = vsyncadd (%p2355_p11), %s1602_s17, 4294967168  ;;  %s3062_s12 = sld [smem:[#allocation22_spill]]  ;;  %p25_p0 = scmp.ge.s32.totalorder %s2800_s19, 4  }
 0x4f3   : > { %s3063_s26 = sld [smem:[#allocation23_spill]]  ;;  %s3064_s24 = smov %s2677_s25 }
 0x4f4   : > { %s3066_s27 = smov %s2800_s19  ;;  %27 = sbr.rel (!%p25_p0) target bundleno = 14 (0xe), region = 125 }
 0x4f8   : > { %s3065_s25 = smov %s3062_s12 }
 0x4f9   :  { %1608 = vsyncpa [#allocation5], 1 }
 0x4fa   :  { %1610 = vsyncpa [#allocation5 + $0x1], 1 }
 0x4fb   :  { %1611 = vsyncpa [#allocation8], 1 }
 0x4fc   :  { %1612 = vsyncpa [#allocation11], 1 }
 0x4fd   :  { %1614 = vsyncpa [#allocation11 + $0x1], 1 }
 0x4fe   :  { %1615 = vsyncpa [#allocation14], 1 }
 0x4ff   :  { %1616 = vsyncpa [#allocation6], 1 }
 0x500   :  { %1618 = vsyncpa [#allocation6 + $0x1], 1 }

</bundles_post_ra>
